<compile_context>
chip_gen: v5e
topology: v5e:2x2
jax: 0.10.0
libtpu: 0.0.40
codegen_flags: <defaults>
</compile_context>

<pallas_src>
import functools

import jax
import jax.numpy as jnp
from jax.experimental import pallas as pl
from jax.experimental.pallas import tpu as pltpu

_EPS = 1e-5                    # PyTorch BatchNorm2d default eps
_MXU_DTYPE = jnp.bfloat16      # MXU operand / activation dtype; accumulation stays f32


# --------------------------------------------------------------------------- helpers


def _vmem_limit_bytes():
    """Generation-aware VMEM cap: ~3/4 of physical, capped at 96 MiB (v7x -> 48 MiB)."""
    try:
        cap = int(pltpu.get_tpu_info().vmem_capacity_bytes)
        return int(min(96 * 1024 * 1024, (cap * 3) // 4))
    except Exception:
        return 32 * 1024 * 1024


def _pick_tile_h(h, w, n, row_target):
    """Largest divisor of H with tile_h*W <= row_target, preferring >= 4 grid tiles (megacore)."""
    divisors = [d for d in range(1, h + 1) if h % d == 0]
    fits = [d for d in divisors if d * w <= max(row_target, w)] or [1]
    for d in sorted(fits, reverse=True):
        if n * (h // d) >= 4:
            return d
    return max(fits)


def _halo_tiles(x_nhwc, tile_h):
    """(N,H,W,C) -> (N*n_h, tile_h+2, W+2, C): zero spatial pad + overlapping H row tiles."""
    n, h, w, c = x_nhwc.shape
    n_h = h // tile_h
    xp = jnp.pad(x_nhwc, ((0, 0), (1, 1), (1, 1), (0, 0)))
    tiles = jnp.stack(
        [xp[:, i * tile_h:i * tile_h + tile_h + 2] for i in range(n_h)], axis=1)
    return tiles.reshape(n * n_h, tile_h + 2, w + 2, c)


# --------------------------------------------------------------------------- kernels


def _conv_im2col_matmul(x, w_ref, y_ref, stats_ref, *, tile_h, width):
    """Shared tail: in-VMEM im2col -> single MXU matmul -> bf16 conv tile + f32 BN partials.

    x        : (tile_h+2, width+2, Cin) bf16   halo tile (conv padding already zero)
    w_ref    : (9*Cin, Cout)            bf16   weights, rows ordered (ky, kx, cin)
    y_ref    : (tile_h*width, Cout)     bf16   pre-BN conv output tile
    stats_ref: (2, Cout)                f32    [sum(y); sum(y*y)] over this tile
    """
    cin = x.shape[-1]
    # kx taps via sublane shifts, then ky taps via cheap leading-dim slices; lane-concatenated
    # so the column order matches w.reshape(9*Cin, Cout) (ky-major, then kx, then cin).
    xw = jnp.concatenate([x[:, kx:kx + width, :] for kx in range(3)], axis=-1)
    cols = jnp.concatenate([xw[ky:ky + tile_h] for ky in range(3)], axis=-1)
    cols = cols.reshape(tile_h * width, 9 * cin)           # (rows, 9*Cin)  (W % 8 == 0 fast path)

    y = jnp.dot(cols, w_ref[...], preferred_element_type=jnp.float32)
    yq = y.astype(y_ref.dtype)
    y_ref[...] = yq

    yr = yq.astype(jnp.float32)
    stats_ref[...] = jnp.concatenate(                      # single (2, Cout) store
        [jnp.sum(yr, axis=0, keepdims=True),
         jnp.sum(yr * yr, axis=0, keepdims=True)], axis=0)


def _conv_stats_kernel(x_ref, w_ref, y_ref, stats_ref, *, tile_h, width):
    """Block-1 conv: raw (zero-padded) halo tile -> conv + BN partial stats."""
    _conv_im2col_matmul(x_ref[...], w_ref, y_ref, stats_ref, tile_h=tile_h, width=width)


def _conv_stats_fused_kernel(x_ref, w_ref, scale_ref, shift_ref, y_ref, stats_ref, *,
                             tile_h, width, n_h):
    """Block-2 conv with block-1's BN+ReLU fused as a prelude on the halo tile in VMEM."""
    cin = x_ref.shape[-1]
    x = x_ref[...].astype(jnp.float32)
    act = jnp.maximum(
        x * scale_ref[...].reshape(1, 1, cin) + shift_ref[...].reshape(1, 1, cin), 0.0)

    # Re-zero the conv-padding ring (positions outside the image): the zero-padded halo would
    # otherwise become relu(shift) != 0 after the affine.
    col = jax.lax.broadcasted_iota(jnp.int32, (tile_h + 2, width + 2, 1), 1)
    row = jax.lax.broadcasted_iota(jnp.int32, (tile_h + 2, width + 2, 1), 0)
    i_h = pl.program_id(0) % n_h                       # h-tile index within the image
    inside = (col >= 1) & (col <= width)
    inside = inside & ((row >= 1) | (i_h > 0))         # top pad row only on the first tile
    inside = inside & ((row <= tile_h) | (i_h < n_h - 1))   # bottom pad row only on the last
    act = jnp.where(inside, act, 0.0).astype(_MXU_DTYPE)

    _conv_im2col_matmul(act, w_ref, y_ref, stats_ref, tile_h=tile_h, width=width)


def _bn_relu_kernel(y_ref, scale_ref, shift_ref, o_ref):
    """Final standalone BN (folded per-channel affine) + ReLU."""
    o_ref[...] = jnp.maximum(
        y_ref[...].astype(jnp.float32) * scale_ref[...] + shift_ref[...], 0.0
    ).astype(o_ref.dtype)


# --------------------------------------------------------------------------- pallas wrappers


def _conv_pass(x_tiles, wmat, scale_prev, shift_prev, *, tile_h, width, n_h, cout, cparams):
    g, _, _, cin = x_tiles.shape
    rows = tile_h * width

    if scale_prev is None:
        kernel = functools.partial(_conv_stats_kernel, tile_h=tile_h, width=width)
        in_specs = [
            pl.BlockSpec((None, tile_h + 2, width + 2, cin), lambda i: (i, 0, 0, 0)),
            pl.BlockSpec((9 * cin, cout), lambda i: (0, 0)),
        ]
        args = (x_tiles, wmat)
    else:
        kernel = functools.partial(_conv_stats_fused_kernel,
                                   tile_h=tile_h, width=width, n_h=n_h)
        in_specs = [
            pl.BlockSpec((None, tile_h + 2, width + 2, cin), lambda i: (i, 0, 0, 0)),
            pl.BlockSpec((9 * cin, cout), lambda i: (0, 0)),
            pl.BlockSpec((1, cin), lambda i: (0, 0)),
            pl.BlockSpec((1, cin), lambda i: (0, 0)),
        ]
        args = (x_tiles, wmat, scale_prev, shift_prev)

    return pl.pallas_call(
        kernel,
        grid=(g,),
        in_specs=in_specs,
        out_specs=(
            pl.BlockSpec((None, rows, cout), lambda i: (i, 0, 0)),
            pl.BlockSpec((None, 2, cout), lambda i: (i, 0, 0)),
        ),
        out_shape=(
            jax.ShapeDtypeStruct((g, rows, cout), _MXU_DTYPE),     # pre-BN conv output (bf16)
            jax.ShapeDtypeStruct((g, 2, cout), jnp.float32),       # per-tile [sum; sumsq]
        ),
        compiler_params=cparams,
    )(*args)


def _bn_relu_pass(y, scale, shift, cparams):
    g, rows, cout = y.shape
    return pl.pallas_call(
        _bn_relu_kernel,
        grid=(g,),
        in_specs=[
            pl.BlockSpec((None, rows, cout), lambda i: (i, 0, 0)),
            pl.BlockSpec((1, cout), lambda i: (0, 0)),
            pl.BlockSpec((1, cout), lambda i: (0, 0)),
        ],
        out_specs=pl.BlockSpec((None, rows, cout), lambda i: (i, 0, 0)),
        out_shape=jax.ShapeDtypeStruct((g, rows, cout), jnp.float32),
        compiler_params=cparams,
    )(y, scale, shift)


def _fold_bn(stats, gamma, beta, count):
    """Reduce per-tile partial sums -> training-mode BN folded into per-channel scale/shift."""
    totals = jnp.sum(stats, axis=0)                               # (2, C)
    mean = totals[0] / count
    var = jnp.maximum(totals[1] / count - mean * mean, 0.0)       # biased variance, guarded
    rstd = jax.lax.rsqrt(var + _EPS)
    scale = gamma * rstd
    shift = beta - mean * scale
    return (scale.reshape(1, -1).astype(jnp.float32),
            shift.reshape(1, -1).astype(jnp.float32))


@functools.partial(jax.jit, static_argnames=("row_target",))
def double_conv(x_nchw, params, *, row_target=512):
    w1, g1, b1, w2, g2, b2 = params
    x = jnp.transpose(x_nchw, (0, 2, 3, 1)).astype(jnp.float32)   # NCHW -> NHWC
    n, h, w, cin = x.shape
    cmid = w1.shape[-1]
    cout = w2.shape[-1]
    p = n * h * w

    tile_h = _pick_tile_h(h, w, n, row_target)
    n_h = h // tile_h

    cparams = pltpu.CompilerParams(
        dimension_semantics=("parallel",),
        vmem_limit_bytes=_vmem_limit_bytes(),
    )

    w1_mat = w1.reshape(9 * cin, cmid).astype(_MXU_DTYPE)         # (ky, kx, cin)-major rows
    w2_mat = w2.reshape(9 * cmid, cout).astype(_MXU_DTYPE)

    # ---- block 1: conv on raw zero-padded input + BN partial stats
    x_tiles = _halo_tiles(x.astype(_MXU_DTYPE), tile_h)
    y1, st1 = _conv_pass(x_tiles, w1_mat, None, None,
                         tile_h=tile_h, width=w, n_h=n_h, cout=cmid, cparams=cparams)
    scale1, shift1 = _fold_bn(st1, g1, b1, p)

    # ---- block 2: conv with block-1's BN+ReLU fused as an in-VMEM prelude on the halo tile
    y1_img = y1.reshape(n, n_h, tile_h, w, cmid).reshape(n, h, w, cmid)
    y1_tiles = _halo_tiles(y1_img, tile_h)                        # bf16 pre-BN + zero halo
    y2, st2 = _conv_pass(y1_tiles, w2_mat, scale1, shift1,
                         tile_h=tile_h, width=w, n_h=n_h, cout=cout, cparams=cparams)
    scale2, shift2 = _fold_bn(st2, g2, b2, p)

    # ---- final BN + ReLU (only standalone bandwidth pass left)
    out = _bn_relu_pass(y2, scale2, shift2, cparams)              # (G, rows, Cout) f32
    out = out.reshape(n, n_h, tile_h, w, cout).reshape(n, h, w, cout)
    return jnp.transpose(out, (0, 3, 1, 2))                       # NHWC -> NCHW


# --------------------------------------------------------------------------- reference & params


def _reference(x_nchw, params, *, quantized):
    """Pure-JAX reference (training-mode BN). quantized=True mirrors the kernel's bf16 points."""
    w1, g1, b1, w2, g2, b2 = params
    x = jnp.transpose(x_nchw, (0, 2, 3, 1))
    cdt = jnp.bfloat16 if quantized else jnp.float32

    def block(x, w, g, b):
        y = jax.lax.conv_general_dilated(
            x.astype(cdt), w.astype(cdt),
            window_strides=(1, 1), padding="SAME",
            dimension_numbers=("NHWC", "HWIO", "NHWC"),
            preferred_element_type=jnp.float32,
            precision=jax.lax.Precision.HIGHEST,
        )
        if quantized:
            y = y.astype(jnp.bfloat16).astype(jnp.float32)        # kernel stores y in bf16
        mean = jnp.mean(y, axis=(0, 1, 2))
        var = jnp.var(y, axis=(0, 1, 2))
        return jnp.maximum((y - mean) * jax.lax.rsqrt(var + _EPS) * g + b, 0.0)

    y = block(x, w1, g1, b1)
    y = block(y, w2, g2, b2)
    return jnp.transpose(y, (0, 3, 1, 2))


def init_params(key, in_channels, out_channels, mid_channels=None):
    """Deterministic synthetic parameters (shapes follow DoubleConv.__init__)."""
    if not mid_channels:
        mid_channels = out_channels
    k1, k2, k3, k4, k5, k6 = jax.random.split(key, 6)
    # Conv weights stored HWIO (PyTorch Conv2d weight is OIHW; same 3x3 taps).
    w1 = 0.2 * jax.random.normal(k1, (3, 3, in_channels, mid_channels), jnp.float32)
    g1 = 1.0 + 0.1 * jax.random.normal(k2, (mid_channels,), jnp.float32)
    b1 = 0.1 * jax.random.normal(k3, (mid_channels,), jnp.float32)
    w2 = 0.2 * jax.random.normal(k4, (3, 3, mid_channels, out_channels), jnp.float32)
    g2 = 1.0 + 0.1 * jax.random.normal(k5, (out_channels,), jnp.float32)
    b2 = 0.1 * jax.random.normal(k6, (out_channels,), jnp.float32)
    return (w1, g1, b1, w2, g2, b2)


if __name__ == "__main__":
    key = jax.random.PRNGKey(0)
    kx, kp = jax.random.split(key)

    N, Cin, Cout, H, W = 2, 4, 8, 16, 16
    x = jax.random.normal(kx, (N, Cin, H, W), jnp.float32)        # PyTorch-style NCHW
    params = init_params(kp, Cin, Cout)

    # tile_h=8 here -> grid of 4 halo row tiles: exercises tiling, the fused BN+ReLU prelude
    # (incl. top/bottom boundary masks) and the cross-tile BN reduction.
    out = jax.block_until_ready(double_conv(x, params))
    assert out.shape == (N, Cout, H, W), out.shape

    # Check vs a reference that mirrors the kernel's bf16 quantization points (tight).
    ref_q = jax.block_until_ready(_reference(x, params, quantized=True))
    err_q = float(jnp.max(jnp.abs(out - ref_q)))
    assert bool(jnp.allclose(out, ref_q, atol=3e-2, rtol=3e-2)), f"bf16-ref max_err={err_q}"

    # Sanity check vs the full-f32 (PyTorch-faithful) reference; looser bound covers the
    # deliberate bf16 MXU operand / activation quantization (stated accuracy contract).
    ref_f = jax.block_until_ready(_reference(x, params, quantized=False))
    err_f = float(jnp.max(jnp.abs(out - ref_f)))
    assert bool(jnp.allclose(out, ref_f, atol=1e-1, rtol=1e-1)), f"f32-ref max_err={err_f}"

    print("KERNEL_OK")
</pallas_src>

<mosaic_0001>
module attributes {stable_mosaic.version = 11 : i64} {
  func.func @_conv_stats_kernel(%arg0: i32, %arg1: memref<1x10x18x4xbf16, #tpu.memory_space<vmem>>, %arg2: memref<36x8xbf16, #tpu.memory_space<vmem>>, %arg3: memref<1x128x8xbf16, #tpu.memory_space<vmem>>, %arg4: memref<1x2x8xf32, #tpu.memory_space<vmem>>) attributes {dimension_semantics = [#tpu.dimension_semantics<parallel>], iteration_bounds = array<i64: 4>, scalar_prefetch = 0 : i64, scratch_operands = 0 : i64, tpu.core_type = #tpu.core_type<tc>, window_params = [{transform_indices = @transform_0, window_bounds = array<i64: 1, 10, 18, 4>}, {pipeline_mode = #tpu.pipeline_mode<synchronous>, transform_indices = @transform_1, window_bounds = array<i64: 36, 8>}, {transform_indices = @transform_2, window_bounds = array<i64: 1, 128, 8>}, {transform_indices = @transform_3, window_bounds = array<i64: 1, 2, 8>}]} {
    %c0 = arith.constant 0 : index
    %c0_0 = arith.constant 0 : index
    %c0_1 = arith.constant 0 : index
    %c0_2 = arith.constant 0 : index
    %0 = vector.load %arg1[%c0, %c0_0, %c0_1, %c0_2] : memref<1x10x18x4xbf16, #tpu.memory_space<vmem>>, vector<1x10x18x4xbf16>
    %1 = vector.shape_cast %0 : vector<1x10x18x4xbf16> to vector<10x18x4xbf16>
    %2 = vector.extract_strided_slice %1 {offsets = [0, 0, 0], sizes = [10, 16, 4], strides = [1, 1, 1]} : vector<10x18x4xbf16> to vector<10x16x4xbf16>
    %3 = vector.extract_strided_slice %1 {offsets = [0, 1, 0], sizes = [10, 16, 4], strides = [1, 1, 1]} : vector<10x18x4xbf16> to vector<10x16x4xbf16>
    %4 = vector.extract_strided_slice %1 {offsets = [0, 2, 0], sizes = [10, 16, 4], strides = [1, 1, 1]} : vector<10x18x4xbf16> to vector<10x16x4xbf16>
    %5 = tpu.concatenate %2, %3, %4 in 2 : vector<10x16x4xbf16>, vector<10x16x4xbf16>, vector<10x16x4xbf16> -> vector<10x16x12xbf16>
    %6 = vector.extract_strided_slice %5 {offsets = [0, 0, 0], sizes = [8, 16, 12], strides = [1, 1, 1]} : vector<10x16x12xbf16> to vector<8x16x12xbf16>
    %7 = vector.extract_strided_slice %5 {offsets = [1, 0, 0], sizes = [8, 16, 12], strides = [1, 1, 1]} : vector<10x16x12xbf16> to vector<8x16x12xbf16>
    %8 = vector.extract_strided_slice %5 {offsets = [2, 0, 0], sizes = [8, 16, 12], strides = [1, 1, 1]} : vector<10x16x12xbf16> to vector<8x16x12xbf16>
    %9 = tpu.concatenate %6, %7, %8 in 2 : vector<8x16x12xbf16>, vector<8x16x12xbf16>, vector<8x16x12xbf16> -> vector<8x16x36xbf16>
    %10 = vector.shape_cast %9 : vector<8x16x36xbf16> to vector<128x36xbf16>
    %c0_3 = arith.constant 0 : index
    %c0_4 = arith.constant 0 : index
    %11 = vector.load %arg2[%c0_3, %c0_4] : memref<36x8xbf16, #tpu.memory_space<vmem>>, vector<36x8xbf16>
    %cst = arith.constant dense<0.000000e+00> : vector<128x8xf32>
    %12 = tpu.matmul %10, %11, %cst {dimension_numbers = #tpu.dot_dimension_numbers<[1], [0], [0], [1], [0, 0, 1, 1], [], []>} : vector<128x36xbf16>, vector<36x8xbf16>, vector<128x8xf32> -> vector<128x8xf32>
    %13 = arith.truncf %12 : vector<128x8xf32> to vector<128x8xbf16>
    %c0_5 = arith.constant 0 : index
    %c0_6 = arith.constant 0 : index
    %c0_7 = arith.constant 0 : index
    %14 = vector.load %arg3[%c0_5, %c0_6, %c0_7] : memref<1x128x8xbf16, #tpu.memory_space<vmem>>, vector<1x128x8xbf16>
    %15 = vector.shape_cast %14 : vector<1x128x8xbf16> to vector<128x8xbf16>
    %16 = vector.shape_cast %13 : vector<128x8xbf16> to vector<1x128x8xbf16>
    tpu.vector_store %arg3[%c0_5, %c0_6, %c0_7], %16 {strides = array<i32>} : memref<1x128x8xbf16, #tpu.memory_space<vmem>>, vector<1x128x8xbf16>,
    %17 = arith.extf %13 : vector<128x8xbf16> to vector<128x8xf32>
    %cst_8 = arith.constant dense<0.000000e+00> : vector<8xf32>
    %18 = vector.multi_reduction <add>, %17, %cst_8 [0] : vector<128x8xf32> to vector<8xf32>
    %19 = vector.shape_cast %18 : vector<8xf32> to vector<1x8xf32>
    %20 = arith.mulf %17, %17 : vector<128x8xf32>
    %cst_9 = arith.constant dense<0.000000e+00> : vector<8xf32>
    %21 = vector.multi_reduction <add>, %20, %cst_9 [0] : vector<128x8xf32> to vector<8xf32>
    %22 = vector.shape_cast %21 : vector<8xf32> to vector<1x8xf32>
    %23 = tpu.concatenate %19, %22 in 0 : vector<1x8xf32>, vector<1x8xf32> -> vector<2x8xf32>
    %c0_10 = arith.constant 0 : index
    %c0_11 = arith.constant 0 : index
    %c0_12 = arith.constant 0 : index
    %24 = vector.load %arg4[%c0_10, %c0_11, %c0_12] : memref<1x2x8xf32, #tpu.memory_space<vmem>>, vector<1x2x8xf32>
    %25 = vector.shape_cast %24 : vector<1x2x8xf32> to vector<2x8xf32>
    %26 = vector.shape_cast %23 : vector<2x8xf32> to vector<1x2x8xf32>
    tpu.vector_store %arg4[%c0_10, %c0_11, %c0_12], %26 {strides = array<i32>} : memref<1x2x8xf32, #tpu.memory_space<vmem>>, vector<1x2x8xf32>,
    return
  }
  func.func @transform_0(%arg0: i32) -> (i32, i32, i32, i32) {
    %c0_i32 = arith.constant 0 : i32
    %c0_i32_0 = arith.constant 0 : i32
    %c0_i32_1 = arith.constant 0 : i32
    %c0_i32_2 = arith.constant 0 : i32
    return %arg0, %c0_i32, %c0_i32_0, %c0_i32_1 : i32, i32, i32, i32
  }
  func.func @transform_1(%arg0: i32) -> (i32, i32) {
    %c0_i32 = arith.constant 0 : i32
    %c0_i32_0 = arith.constant 0 : i32
    %c0_i32_1 = arith.constant 0 : i32
    return %c0_i32, %c0_i32_0 : i32, i32
  }
  func.func @transform_2(%arg0: i32) -> (i32, i32, i32) {
    %c0_i32 = arith.constant 0 : i32
    %c0_i32_0 = arith.constant 0 : i32
    %c0_i32_1 = arith.constant 0 : i32
    return %arg0, %c0_i32, %c0_i32_0 : i32, i32, i32
  }
  func.func @transform_3(%arg0: i32) -> (i32, i32, i32) {
    %c0_i32 = arith.constant 0 : i32
    %c0_i32_0 = arith.constant 0 : i32
    %c0_i32_1 = arith.constant 0 : i32
    return %arg0, %c0_i32, %c0_i32_0 : i32, i32, i32
  }
}

module attributes {stable_mosaic.version = 11 : i64} {
  func.func @_bn_relu_kernel(%arg0: i32, %arg1: memref<1x128x8xbf16, #tpu.memory_space<vmem>>, %arg2: memref<1x8xf32, #tpu.memory_space<vmem>>, %arg3: memref<1x8xf32, #tpu.memory_space<vmem>>, %arg4: memref<1x128x8xf32, #tpu.memory_space<vmem>>) attributes {dimension_semantics = [#tpu.dimension_semantics<parallel>], iteration_bounds = array<i64: 4>, scalar_prefetch = 0 : i64, scratch_operands = 0 : i64, tpu.core_type = #tpu.core_type<tc>, window_params = [{transform_indices = @transform_0, window_bounds = array<i64: 1, 128, 8>}, {pipeline_mode = #tpu.pipeline_mode<synchronous>, transform_indices = @transform_1, window_bounds = array<i64: 1, 8>}, {pipeline_mode = #tpu.pipeline_mode<synchronous>, transform_indices = @transform_2, window_bounds = array<i64: 1, 8>}, {transform_indices = @transform_3, window_bounds = array<i64: 1, 128, 8>}]} {
    %c0 = arith.constant 0 : index
    %c0_0 = arith.constant 0 : index
    %c0_1 = arith.constant 0 : index
    %0 = vector.load %arg1[%c0, %c0_0, %c0_1] : memref<1x128x8xbf16, #tpu.memory_space<vmem>>, vector<1x128x8xbf16>
    %1 = vector.shape_cast %0 : vector<1x128x8xbf16> to vector<128x8xbf16>
    %2 = arith.extf %1 : vector<128x8xbf16> to vector<128x8xf32>
    %c0_2 = arith.constant 0 : index
    %c0_3 = arith.constant 0 : index
    %3 = vector.load %arg2[%c0_2, %c0_3] : memref<1x8xf32, #tpu.memory_space<vmem>>, vector<1x8xf32>
    %4 = vector.broadcast %3 : vector<1x8xf32> to vector<128x8xf32>
    %5 = arith.mulf %2, %4 : vector<128x8xf32>
    %c0_4 = arith.constant 0 : index
    %c0_5 = arith.constant 0 : index
    %6 = vector.load %arg3[%c0_4, %c0_5] : memref<1x8xf32, #tpu.memory_space<vmem>>, vector<1x8xf32>
    %7 = vector.broadcast %6 : vector<1x8xf32> to vector<128x8xf32>
    %8 = arith.addf %5, %7 : vector<128x8xf32>
    %cst = arith.constant 0.000000e+00 : f32
    %9 = vector.broadcast %cst : f32 to vector<128x8xf32>
    %10 = arith.maximumf %8, %9 : vector<128x8xf32>
    %c0_6 = arith.constant 0 : index
    %c0_7 = arith.constant 0 : index
    %c0_8 = arith.constant 0 : index
    %11 = vector.load %arg4[%c0_6, %c0_7, %c0_8] : memref<1x128x8xf32, #tpu.memory_space<vmem>>, vector<1x128x8xf32>
    %12 = vector.shape_cast %11 : vector<1x128x8xf32> to vector<128x8xf32>
    %13 = vector.shape_cast %10 : vector<128x8xf32> to vector<1x128x8xf32>
    tpu.vector_store %arg4[%c0_6, %c0_7, %c0_8], %13 {strides = array<i32>} : memref<1x128x8xf32, #tpu.memory_space<vmem>>, vector<1x128x8xf32>,
    return
  }
  func.func @transform_0(%arg0: i32) -> (i32, i32, i32) {
    %c0_i32 = arith.constant 0 : i32
    %c0_i32_0 = arith.constant 0 : i32
    %c0_i32_1 = arith.constant 0 : i32
    return %arg0, %c0_i32, %c0_i32_0 : i32, i32, i32
  }
  func.func @transform_1(%arg0: i32) -> (i32, i32) {
    %c0_i32 = arith.constant 0 : i32
    %c0_i32_0 = arith.constant 0 : i32
    %c0_i32_1 = arith.constant 0 : i32
    return %c0_i32, %c0_i32_0 : i32, i32
  }
  func.func @transform_2(%arg0: i32) -> (i32, i32) {
    %c0_i32 = arith.constant 0 : i32
    %c0_i32_0 = arith.constant 0 : i32
    %c0_i32_1 = arith.constant 0 : i32
    return %c0_i32, %c0_i32_0 : i32, i32
  }
  func.func @transform_3(%arg0: i32) -> (i32, i32, i32) {
    %c0_i32 = arith.constant 0 : i32
    %c0_i32_0 = arith.constant 0 : i32
    %c0_i32_1 = arith.constant 0 : i32
    return %arg0, %c0_i32, %c0_i32_0 : i32, i32, i32
  }
}

module attributes {stable_mosaic.version = 11 : i64} {
  func.func @_conv_stats_fused_kernel(%arg0: i32, %arg1: memref<1x10x18x8xbf16, #tpu.memory_space<vmem>>, %arg2: memref<72x8xbf16, #tpu.memory_space<vmem>>, %arg3: memref<1x8xf32, #tpu.memory_space<vmem>>, %arg4: memref<1x8xf32, #tpu.memory_space<vmem>>, %arg5: memref<1x128x8xbf16, #tpu.memory_space<vmem>>, %arg6: memref<1x2x8xf32, #tpu.memory_space<vmem>>) attributes {dimension_semantics = [#tpu.dimension_semantics<parallel>], iteration_bounds = array<i64: 4>, scalar_prefetch = 0 : i64, scratch_operands = 0 : i64, tpu.core_type = #tpu.core_type<tc>, window_params = [{transform_indices = @transform_0, window_bounds = array<i64: 1, 10, 18, 8>}, {pipeline_mode = #tpu.pipeline_mode<synchronous>, transform_indices = @transform_1, window_bounds = array<i64: 72, 8>}, {pipeline_mode = #tpu.pipeline_mode<synchronous>, transform_indices = @transform_2, window_bounds = array<i64: 1, 8>}, {pipeline_mode = #tpu.pipeline_mode<synchronous>, transform_indices = @transform_3, window_bounds = array<i64: 1, 8>}, {transform_indices = @transform_4, window_bounds = array<i64: 1, 128, 8>}, {transform_indices = @transform_5, window_bounds = array<i64: 1, 2, 8>}]} {
    %c0 = arith.constant 0 : index
    %c0_0 = arith.constant 0 : index
    %c0_1 = arith.constant 0 : index
    %c0_2 = arith.constant 0 : index
    %0 = vector.load %arg1[%c0, %c0_0, %c0_1, %c0_2] : memref<1x10x18x8xbf16, #tpu.memory_space<vmem>>, vector<1x10x18x8xbf16>
    %1 = vector.shape_cast %0 : vector<1x10x18x8xbf16> to vector<10x18x8xbf16>
    %2 = arith.extf %1 : vector<10x18x8xbf16> to vector<10x18x8xf32>
    %c0_3 = arith.constant 0 : index
    %c0_4 = arith.constant 0 : index
    %3 = vector.load %arg3[%c0_3, %c0_4] : memref<1x8xf32, #tpu.memory_space<vmem>>, vector<1x8xf32>
    %4 = vector.shape_cast %3 : vector<1x8xf32> to vector<1x1x8xf32>
    %5 = vector.broadcast %4 : vector<1x1x8xf32> to vector<10x18x8xf32>
    %6 = arith.mulf %2, %5 : vector<10x18x8xf32>
    %c0_5 = arith.constant 0 : index
    %c0_6 = arith.constant 0 : index
    %7 = vector.load %arg4[%c0_5, %c0_6] : memref<1x8xf32, #tpu.memory_space<vmem>>, vector<1x8xf32>
    %8 = vector.shape_cast %7 : vector<1x8xf32> to vector<1x1x8xf32>
    %9 = vector.broadcast %8 : vector<1x1x8xf32> to vector<10x18x8xf32>
    %10 = arith.addf %6, %9 : vector<10x18x8xf32>
    %cst = arith.constant 0.000000e+00 : f32
    %11 = vector.broadcast %cst : f32 to vector<10x18x8xf32>
    %12 = arith.maximumf %10, %11 : vector<10x18x8xf32>
    %13 = tpu.iota {dimensions = array<i32: 1>} : vector<10x18x1xi32>
    %14 = tpu.iota {dimensions = array<i32: 0>} : vector<10x18x1xi32>
    %c2_i32 = arith.constant 2 : i32
    %c0_i32 = arith.constant 0 : i32
    %15 = arith.cmpi eq, %c2_i32, %c0_i32 : i32
    %c1_i32 = arith.constant 1 : i32
    %16 = arith.select %15, %c1_i32, %c2_i32 : i32
    %17 = arith.remsi %arg0, %16 : i32
    %c0_i32_7 = arith.constant 0 : i32
    %18 = arith.cmpi ne, %17, %c0_i32_7 : i32
    %c0_i32_8 = arith.constant 0 : i32
    %19 = arith.cmpi slt, %17, %c0_i32_8 : i32
    %c0_i32_9 = arith.constant 0 : i32
    %20 = arith.cmpi slt, %16, %c0_i32_9 : i32
    %21 = arith.xori %19, %20 : i1
    %22 = arith.andi %21, %18 : i1
    %23 = arith.addi %17, %16 : i32
    %24 = arith.select %22, %23, %17 : i32
    %c1_i32_10 = arith.constant 1 : i32
    %25 = vector.broadcast %c1_i32_10 : i32 to vector<10x18x1xi32>
    %26 = arith.cmpi sge, %13, %25 : vector<10x18x1xi32>
    %c16_i32 = arith.constant 16 : i32
    %27 = vector.broadcast %c16_i32 : i32 to vector<10x18x1xi32>
    %28 = arith.cmpi sle, %13, %27 : vector<10x18x1xi32>
    %29 = arith.andi %26, %28 : vector<10x18x1xi1>
    %c1_i32_11 = arith.constant 1 : i32
    %30 = vector.broadcast %c1_i32_11 : i32 to vector<10x18x1xi32>
    %31 = arith.cmpi sge, %14, %30 : vector<10x18x1xi32>
    %c0_i32_12 = arith.constant 0 : i32
    %32 = arith.cmpi sgt, %24, %c0_i32_12 : i32
    %33 = vector.broadcast %32 : i1 to vector<10x18x1xi1>
    %34 = arith.ori %31, %33 : vector<10x18x1xi1>
    %35 = arith.andi %29, %34 : vector<10x18x1xi1>
    %c8_i32 = arith.constant 8 : i32
    %36 = vector.broadcast %c8_i32 : i32 to vector<10x18x1xi32>
    %37 = arith.cmpi sle, %14, %36 : vector<10x18x1xi32>
    %c1_i32_13 = arith.constant 1 : i32
    %38 = arith.cmpi slt, %24, %c1_i32_13 : i32
    %39 = vector.broadcast %38 : i1 to vector<10x18x1xi1>
    %40 = arith.ori %37, %39 : vector<10x18x1xi1>
    %41 = arith.andi %35, %40 : vector<10x18x1xi1>
    %cst_14 = arith.constant 0.000000e+00 : f32
    %42 = vector.shape_cast %41 : vector<10x18x1xi1> to vector<10x18x1xi1>
    %43 = vector.broadcast %42 : vector<10x18x1xi1> to vector<10x18x8xi1>
    %44 = vector.broadcast %cst_14 : f32 to vector<10x18x8xf32>
    %45 = arith.select %43, %12, %44 : vector<10x18x8xi1>, vector<10x18x8xf32>
    %46 = arith.truncf %45 : vector<10x18x8xf32> to vector<10x18x8xbf16>
    %47 = vector.extract_strided_slice %46 {offsets = [0, 0, 0], sizes = [10, 16, 8], strides = [1, 1, 1]} : vector<10x18x8xbf16> to vector<10x16x8xbf16>
    %48 = vector.extract_strided_slice %46 {offsets = [0, 1, 0], sizes = [10, 16, 8], strides = [1, 1, 1]} : vector<10x18x8xbf16> to vector<10x16x8xbf16>
    %49 = vector.extract_strided_slice %46 {offsets = [0, 2, 0], sizes = [10, 16, 8], strides = [1, 1, 1]} : vector<10x18x8xbf16> to vector<10x16x8xbf16>
    %50 = tpu.concatenate %47, %48, %49 in 2 : vector<10x16x8xbf16>, vector<10x16x8xbf16>, vector<10x16x8xbf16> -> vector<10x16x24xbf16>
    %51 = vector.extract_strided_slice %50 {offsets = [0, 0, 0], sizes = [8, 16, 24], strides = [1, 1, 1]} : vector<10x16x24xbf16> to vector<8x16x24xbf16>
    %52 = vector.extract_strided_slice %50 {offsets = [1, 0, 0], sizes = [8, 16, 24], strides = [1, 1, 1]} : vector<10x16x24xbf16> to vector<8x16x24xbf16>
    %53 = vector.extract_strided_slice %50 {offsets = [2, 0, 0], sizes = [8, 16, 24], strides = [1, 1, 1]} : vector<10x16x24xbf16> to vector<8x16x24xbf16>
    %54 = tpu.concatenate %51, %52, %53 in 2 : vector<8x16x24xbf16>, vector<8x16x24xbf16>, vector<8x16x24xbf16> -> vector<8x16x72xbf16>
    %55 = vector.shape_cast %54 : vector<8x16x72xbf16> to vector<128x72xbf16>
    %c0_15 = arith.constant 0 : index
    %c0_16 = arith.constant 0 : index
    %56 = vector.load %arg2[%c0_15, %c0_16] : memref<72x8xbf16, #tpu.memory_space<vmem>>, vector<72x8xbf16>
    %cst_17 = arith.constant dense<0.000000e+00> : vector<128x8xf32>
    %57 = tpu.matmul %55, %56, %cst_17 {dimension_numbers = #tpu.dot_dimension_numbers<[1], [0], [0], [1], [0, 0, 1, 1], [], []>} : vector<128x72xbf16>, vector<72x8xbf16>, vector<128x8xf32> -> vector<128x8xf32>
    %58 = arith.truncf %57 : vector<128x8xf32> to vector<128x8xbf16>
    %c0_18 = arith.constant 0 : index
    %c0_19 = arith.constant 0 : index
    %c0_20 = arith.constant 0 : index
    %59 = vector.load %arg5[%c0_18, %c0_19, %c0_20] : memref<1x128x8xbf16, #tpu.memory_space<vmem>>, vector<1x128x8xbf16>
    %60 = vector.shape_cast %59 : vector<1x128x8xbf16> to vector<128x8xbf16>
    %61 = vector.shape_cast %58 : vector<128x8xbf16> to vector<1x128x8xbf16>
    tpu.vector_store %arg5[%c0_18, %c0_19, %c0_20], %61 {strides = array<i32>} : memref<1x128x8xbf16, #tpu.memory_space<vmem>>, vector<1x128x8xbf16>,
    %62 = arith.extf %58 : vector<128x8xbf16> to vector<128x8xf32>
    %cst_21 = arith.constant dense<0.000000e+00> : vector<8xf32>
    %63 = vector.multi_reduction <add>, %62, %cst_21 [0] : vector<128x8xf32> to vector<8xf32>
    %64 = vector.shape_cast %63 : vector<8xf32> to vector<1x8xf32>
    %65 = arith.mulf %62, %62 : vector<128x8xf32>
    %cst_22 = arith.constant dense<0.000000e+00> : vector<8xf32>
    %66 = vector.multi_reduction <add>, %65, %cst_22 [0] : vector<128x8xf32> to vector<8xf32>
    %67 = vector.shape_cast %66 : vector<8xf32> to vector<1x8xf32>
    %68 = tpu.concatenate %64, %67 in 0 : vector<1x8xf32>, vector<1x8xf32> -> vector<2x8xf32>
    %c0_23 = arith.constant 0 : index
    %c0_24 = arith.constant 0 : index
    %c0_25 = arith.constant 0 : index
    %69 = vector.load %arg6[%c0_23, %c0_24, %c0_25] : memref<1x2x8xf32, #tpu.memory_space<vmem>>, vector<1x2x8xf32>
    %70 = vector.shape_cast %69 : vector<1x2x8xf32> to vector<2x8xf32>
    %71 = vector.shape_cast %68 : vector<2x8xf32> to vector<1x2x8xf32>
    tpu.vector_store %arg6[%c0_23, %c0_24, %c0_25], %71 {strides = array<i32>} : memref<1x2x8xf32, #tpu.memory_space<vmem>>, vector<1x2x8xf32>,
    return
  }
  func.func @transform_0(%arg0: i32) -> (i32, i32, i32, i32) {
    %c0_i32 = arith.constant 0 : i32
    %c0_i32_0 = arith.constant 0 : i32
    %c0_i32_1 = arith.constant 0 : i32
    %c0_i32_2 = arith.constant 0 : i32
    return %arg0, %c0_i32, %c0_i32_0, %c0_i32_1 : i32, i32, i32, i32
  }
  func.func @transform_1(%arg0: i32) -> (i32, i32) {
    %c0_i32 = arith.constant 0 : i32
    %c0_i32_0 = arith.constant 0 : i32
    %c0_i32_1 = arith.constant 0 : i32
    return %c0_i32, %c0_i32_0 : i32, i32
  }
  func.func @transform_2(%arg0: i32) -> (i32, i32) {
    %c0_i32 = arith.constant 0 : i32
    %c0_i32_0 = arith.constant 0 : i32
    %c0_i32_1 = arith.constant 0 : i32
    return %c0_i32, %c0_i32_0 : i32, i32
  }
  func.func @transform_3(%arg0: i32) -> (i32, i32) {
    %c0_i32 = arith.constant 0 : i32
    %c0_i32_0 = arith.constant 0 : i32
    %c0_i32_1 = arith.constant 0 : i32
    return %c0_i32, %c0_i32_0 : i32, i32
  }
  func.func @transform_4(%arg0: i32) -> (i32, i32, i32) {
    %c0_i32 = arith.constant 0 : i32
    %c0_i32_0 = arith.constant 0 : i32
    %c0_i32_1 = arith.constant 0 : i32
    return %arg0, %c0_i32, %c0_i32_0 : i32, i32, i32
  }
  func.func @transform_5(%arg0: i32) -> (i32, i32, i32) {
    %c0_i32 = arith.constant 0 : i32
    %c0_i32_0 = arith.constant 0 : i32
    %c0_i32_1 = arith.constant 0 : i32
    return %arg0, %c0_i32, %c0_i32_0 : i32, i32, i32
  }
}

</mosaic_0001>

<bundles_post_ra>
// kernel: double_conv.5
= control target key start
LH: loop header
LB: loop body
LE: loop exit
PB: predicated region body
PF: predicated region fallthrough
CT: control target
= control target key end

     0   :  { %s421_s12 = smov 0   ;;  %s528_s0 = inlined_call_operand.vmem [shape: bf16[4,128,8], index: 0, kind: input, shape index: {}]   ;;  %s529_s1 = inlined_call_operand.vmem [shape: f32[1,8], index: 1, kind: input, shape index: {}]   ;;  %s530_s2 = inlined_call_operand.vmem [shape: f32[1,8], index: 2, kind: input, shape index: {}]   ;;  %s531_s3 = inlined_call_operand.vmem [shape: f32[4,128,8], index: 3, kind: output, shape index: {}]  }
   0x1 LB: > { %s331_s13 = sadd.s32 4294967295, %s399_s12   ;;  %p335_p0 = scmp.ge.s32.totalorder %s399_s12, 1  ;;  %s399_s12 = sphi %s421_s12, %s13_s12  }
   0x2   : > { %p137_p1 = scmp.lt.s32.totalorder %s399_s12, 5 }
   0x4   : > { %p138_p2 = pnand %p335_p0, %p137_p1 }
   0x5   : > { %p161_p3 = scmp.lt.s32.totalorder (!%p138_p2), %s331_s13, 3 }
   0x6   : > { %141 = sbr.rel (%p138_p2) target bundleno = 39 (0x27), region = 32 }
   0xb   : > { %s533_s13 = smov (!%p161_p3, %s331_s13), 3  ;;  %v440_v0 = vld [vmem:[%s529_s1] ss:$0 sm:$0xff]  ;;  %vm259_vm0 = vcmask 64512  }
   0xc   : > { %s342_s14 = sshll.u32 %s533_s13, 6  ;;  %v448_v5 = vld [vmem:[%s530_s2] ss:$0 sm:$0xff]  ;;  %s343_s22 = sshll.u32 %s533_s13, 7 }
   0xd   : > { %s435_s17 = scalar_lea.vmem %s528_s0, %s342_s14  ;;  %s467_s25 = scalar_lea.vmem %s531_s3, %s343_s22 }
   0xe   : > { %v345_v1 = vld [vmem:[%s435_s17] sm:$0xff]   ;;  %v376_v2 = vld [vmem:[%s435_s17 + $0x8] sm:$0xff]   ;;  %v377_v3 = vld [vmem:[%s435_s17 + $0x10] sm:$0xff]  }
   0xf   : > { %v346_v4 = vunpack.c.l.bf16 %v345_v1  ;;  %v347_v6 = vunpack.c.h.bf16 %v345_v1  ;;  %v350_v7 = vunpack.c.l.bf16 %v376_v2  ;;  %v351_v8 = vunpack.c.h.bf16 %v376_v2  ;;  %v378_v9 = vld [vmem:[%s435_s17 + $0x18] sm:$0xff]   ;;  %v379_v30 = vld [vmem:[%s435_s17 + $0x20] sm:$0xff]   ;;  %v380_v31 = vld [vmem:[%s435_s17 + $0x28] sm:$0xff]  }
  0x10   : > { %v354_v10 = vunpack.c.l.bf16 %v377_v3  ;;  %v355_v11 = vunpack.c.h.bf16 %v377_v3  ;;  %v358_v12 = vunpack.c.l.bf16 %v378_v9  ;;  %v359_v13 = vunpack.c.h.bf16 %v378_v9  ;;  %v381_v36 = vld [vmem:[%s435_s17 + $0x30] sm:$0xff]   ;;  %v382_v37 = vld [vmem:[%s435_s17 + $0x38] sm:$0xff]  }
  0x11   : > { %v207_v14 = vmul.f32 %v440_v0, %v346_v4  ;;  %v208_v15 = vmul.f32 %v440_v0, %v347_v6  ;;  %v209_v16 = vmul.f32 %v440_v0, %v350_v7  ;;  %v210_v17 = vmul.f32 %v440_v0, %v351_v8 }
  0x12   : > { %v211_v18 = vmul.f32 %v440_v0, %v354_v10  ;;  %v212_v19 = vmul.f32 %v440_v0, %v355_v11  ;;  %v213_v20 = vmul.f32 %v440_v0, %v358_v12  ;;  %v214_v21 = vmul.f32 %v440_v0, %v359_v13 }
  0x13   : > { %v227_v22 = vadd.f32 %v448_v5, %v207_v14  ;;  %v228_v23 = vadd.f32 %v448_v5, %v208_v15  ;;  %v229_v24 = vadd.f32 %v448_v5, %v209_v16  ;;  %v230_v25 = vadd.f32 %v448_v5, %v210_v17 }
  0x14   : > { %v231_v26 = vadd.f32 %v448_v5, %v211_v18  ;;  %v232_v27 = vadd.f32 %v448_v5, %v212_v19  ;;  %v233_v28 = vadd.f32 %v448_v5, %v213_v20  ;;  %v234_v29 = vadd.f32 %v448_v5, %v214_v21 }
  0x15   : > { %v243_v32 = vmax.f32 %v227_v22, 0.0  ;;  %v244_v33 = vmax.f32 %v228_v23, 0.0  ;;  %v245_v34 = vmax.f32 %v229_v24, 0.0  ;;  %v246_v35 = vmax.f32 %v230_v25, 0.0 }
  0x16   : > { %v247_v38 = vmax.f32 %v231_v26, 0.0  ;;  %v248_v39 = vmax.f32 %v232_v27, 0.0  ;;  %v249_v40 = vmax.f32 %v233_v28, 0.0  ;;  %v250_v41 = vmax.f32 %v234_v29, 0.0 }
  0x17   : > { %260 = vst.msk [vmem:[%s467_s25] sm:$0xff] %vm259_vm0, %v243_v32  ;;  %v362_v42 = vunpack.c.l.bf16 %v379_v30  ;;  %v363_v43 = vunpack.c.h.bf16 %v379_v30  ;;  %v366_v44 = vunpack.c.l.bf16 %v380_v31  ;;  %v367_v45 = vunpack.c.h.bf16 %v380_v31 }
  0x18   : > { %261 = vst.msk [vmem:[%s467_s25 + $0x8] sm:$0xff] %vm259_vm0, %v244_v33  ;;  %v370_v46 = vunpack.c.l.bf16 %v381_v36  ;;  %v371_v47 = vunpack.c.h.bf16 %v381_v36  ;;  %v374_v48 = vunpack.c.l.bf16 %v382_v37  ;;  %v375_v49 = vunpack.c.h.bf16 %v382_v37 }
  0x19   : > { %262 = vst.msk [vmem:[%s467_s25 + $0x10] sm:$0xff] %vm259_vm0, %v245_v34  ;;  %v215_v50 = vmul.f32 %v440_v0, %v362_v42  ;;  %v216_v51 = vmul.f32 %v440_v0, %v363_v43  ;;  %v217_v52 = vmul.f32 %v440_v0, %v366_v44  ;;  %v218_v53 = vmul.f32 %v440_v0, %v367_v45 }
  0x1a   : > { %263 = vst.msk [vmem:[%s467_s25 + $0x18] sm:$0xff] %vm259_vm0, %v246_v35  ;;  %v219_v54 = vmul.f32 %v440_v0, %v370_v46  ;;  %v220_v55 = vmul.f32 %v440_v0, %v371_v47  ;;  %v221_v56 = vmul.f32 %v440_v0, %v374_v48  ;;  %v222_v57 = vmul.f32 %v440_v0, %v375_v49 }
  0x1b   : > { %264 = vst.msk [vmem:[%s467_s25 + $0x20] sm:$0xff] %vm259_vm0, %v247_v38  ;;  %v235_v58 = vadd.f32 %v448_v5, %v215_v50  ;;  %v236_v59 = vadd.f32 %v448_v5, %v216_v51  ;;  %v237_v60 = vadd.f32 %v448_v5, %v217_v52  ;;  %v238_v61 = vadd.f32 %v448_v5, %v218_v53 }
  0x1c   : > { %265 = vst.msk [vmem:[%s467_s25 + $0x28] sm:$0xff] %vm259_vm0, %v248_v39  ;;  %v239_v62 = vadd.f32 %v448_v5, %v219_v54  ;;  %v240_v63 = vadd.f32 %v448_v5, %v220_v55  ;;  %v241_v3 = vadd.f32 %v448_v5, %v221_v56  ;;  %v242_v6 = vadd.f32 %v448_v5, %v222_v57 }
  0x1d   : > { %266 = vst.msk [vmem:[%s467_s25 + $0x30] sm:$0xff] %vm259_vm0, %v249_v40  ;;  %v251_v0 = vmax.f32 %v235_v58, 0.0  ;;  %v252_v1 = vmax.f32 %v236_v59, 0.0  ;;  %v253_v2 = vmax.f32 %v237_v60, 0.0  ;;  %v254_v4 = vmax.f32 %v238_v61, 0.0 }
  0x1e   : > { %267 = vst.msk [vmem:[%s467_s25 + $0x38] sm:$0xff] %vm259_vm0, %v250_v41  ;;  %v255_v7 = vmax.f32 %v239_v62, 0.0  ;;  %v256_v8 = vmax.f32 %v240_v63, 0.0  ;;  %v257_v9 = vmax.f32 %v241_v3, 0.0  ;;  %v258_v10 = vmax.f32 %v242_v6, 0.0 }
  0x1f   : > { %268 = vst.msk [vmem:[%s467_s25 + $0x40] sm:$0xff] %vm259_vm0, %v251_v0 }
  0x20   : > { %269 = vst.msk [vmem:[%s467_s25 + $0x48] sm:$0xff] %vm259_vm0, %v252_v1 }
  0x21   : > { %270 = vst.msk [vmem:[%s467_s25 + $0x50] sm:$0xff] %vm259_vm0, %v253_v2 }
  0x22   : > { %271 = vst.msk [vmem:[%s467_s25 + $0x58] sm:$0xff] %vm259_vm0, %v254_v4 }
  0x23   : > { %272 = vst.msk [vmem:[%s467_s25 + $0x60] sm:$0xff] %vm259_vm0, %v255_v7 }
  0x24   : > { %273 = vst.msk [vmem:[%s467_s25 + $0x68] sm:$0xff] %vm259_vm0, %v256_v8 }
  0x25   : > { %274 = vst.msk [vmem:[%s467_s25 + $0x70] sm:$0xff] %vm259_vm0, %v257_v9 }
  0x26   : > { %275 = vst.msk [vmem:[%s467_s25 + $0x78] sm:$0xff] %vm259_vm0, %v258_v10 }
  0x27 PF: > { %s13_s12 = sadd.s32 1, %s399_s12  }
  0x28   : > { %p10_p4 = scmp.ge.s32.totalorder %s13_s12, 6  }
  0x2a   :  { %12 = sbr.rel (!%p10_p4) target bundleno = 1 (0x1), region = 62 }

// kernel: double_conv.3
= control target key start
LH: loop header
LB: loop body
LE: loop exit
PB: predicated region body
PF: predicated region fallthrough
CT: control target
= control target key end

     0   :  { %s1055_s12 = smov 0   ;;  %s1374_s0 = inlined_call_operand.vmem [shape: bf16[4,10,18,4], index: 0, kind: input, shape index: {}]   ;;  %s1375_s1 = inlined_call_operand.vmem [shape: bf16[36,8], index: 1, kind: input, shape index: {}]   ;;  %s1376_s2 = inlined_call_operand.vmem [shape: bf16[4,128,8], index: 2, kind: output, shape index: {0}]   ;;  %s1377_s3 = inlined_call_operand.vmem [shape: f32[4,2,8], index: 3, kind: output, shape index: {1}]  }
   0x1 LB: > { %s921_s13 = sadd.s32 4294967295, %s1029_s12   ;;  %p925_p0 = scmp.ge.s32.totalorder %s1029_s12, 1  ;;  %s1029_s12 = sphi %s1055_s12, %s14_s12  }
   0x2   : > { %p140_p1 = scmp.lt.s32.totalorder %s1029_s12, 5 }
   0x4   : > { %p141_p2 = pnand %p925_p0, %p140_p1 }
   0x5   : > { %p168_p3 = scmp.lt.s32.totalorder (!%p141_p2), %s921_s13, 3  ;;  %s1031_s18 = smov (!%p141_p2), 8  }
   0x6   : > { %144 = sbr.rel (%p141_p2) target bundleno = 476 (0x1dc), region = 28  ;;  %s1032_s19 = smov (!%p141_p2), 4  }
   0x7   : > { %s1033_s20 = smov (!%p141_p2), 12   ;;  %s1034_s21 = smov (!%p141_p2), 24  }
   0xb   : > { %s1379_s13 = smov (!%p168_p3, %s921_s13), 3  ;;  %vm434_vm0 = vcmask 1046528   ;;  %vm293_vm1 = vsmask.f32 7424  ;;  %vm485_vm2 = vcmask 31744   ;;  %vm506_vm3 = vcmask 64512  }
   0xc   : > { %s1010_s14 = smul.u32 120, %s1379_s13  ;;  %vm639_vm4 = vcmask 1041408   ;;  %vm585_vm5 = vcmask 195584   ;;  %vm568_vm6 = vcmask 97280   ;;  %vm622_vm7 = vcmask 293888   ;;  %s988_s28 = sshll.u32 %s1379_s13, 6 }
   0xd   : > { %s1297_s4 = scalar_lea.vmem %s1376_s2, %s988_s28  ;;  %vm708_vm8 = vcmask 60416   ;;  %s929_s5 = sshll.u32 %s1379_s13, 1  ;;  %vm831_vm9 = vcmask 1040384   ;;  %vm833_vm10 = vcmask 58368  }
   0xe   : > { %s1069_s17 = scalar_lea.vmem %s1374_s0, %s1010_s14  ;;  %s181_s8 = scalar_lea.vmem %s1377_s3, %s929_s5 }
   0xf   : > { %v1072_v0 = vld [vmem:[%s1069_s17 + $0x24] sm:$0xff]  ;;  %v194_v1 = vld [vmem:[%s1069_s17 + $0x2c] sm:$0x1]  ;;  %v188_v4 = vld [vmem:[%s1069_s17 + $0x14] sm:$0x1] }
  0x10   : > { %v1076_v2 = vld [vmem:[%s1069_s17 + $0xc] sm:$0xff]  ;;  %v276_v3 = vunpack.c.l.b16 %v194_v1  ;;  %v191_v5 = vld [vmem:[%s1069_s17 + $0x20] sm:$0x1]  ;;  %v274_v6 = vunpack.c.l.b16 %v188_v4  ;;  %v197_v9 = vld [vmem:[%s1069_s17 + $0x38] sm:$0x1]  ;;  %v444_v11 = vrot.slane %v1072_v0, 1 }
  0x11   : > { %v275_v7 = vunpack.c.l.b16 %v191_v5  ;;  %v1081_v8 = vld [vmem:[%s1069_s17 + $0x30] sm:$0xff]  ;;  %v309_v12 = vshll.u32 %v1076_v2, 16  ;;  %v200_v13 = vld [vmem:[%s1069_s17 + $0x44] sm:$0x1]  ;;  %v438_v15 = vrot.slane %v1076_v2, 1  ;;  %v307_v16 = vshrl.u32 %v1076_v2, 16 }
  0x12   : > { %v286_v10 = vpack.c.b16 %v276_v3, %v276_v3  ;;  %v284_v14 = vpack.c.b16 %v274_v6, %v274_v6  ;;  %v277_v17 = vunpack.c.l.b16 %v197_v9  ;;  %v1090_v19 = vld [vmem:[%s1069_s17 + $0x18] sm:$0xff]  ;;  %v447_v22 = vrot.slane %v1081_v8, 1  ;;  %v203_v39 = vld [vmem:[%s1069_s17 + $0x50] sm:$0x1]  ;;  %v1114_v49 = vld [vmem:[%s1069_s17 + $0x48] sm:$0xff] }
  0x13   : > { %v285_v20 = vpack.c.b16 %v275_v7, %v275_v7  ;;  %v311_v21 = vrot.slane %v309_v12, 1  ;;  %v1094_v26 = vld [vmem:[%s1069_s17 + $0x3c] sm:$0xff]  ;;  %v278_v27 = vunpack.c.l.b16 %v200_v13  ;;  %v441_v31 = vrot.slane %v1090_v19, 1  ;;  %v209_v6 = vld [vmem:[%s1069_s17 + $0x68] sm:$0x1] }
  0x14   : > { %v445_v18 = vrot.slane %v286_v10, 1  ;;  %v439_v23 = vrot.slane %v284_v14, 1  ;;  %v314_v24 = vshll.u32 %v284_v14, 16  ;;  %v287_v25 = vpack.c.b16 %v277_v17, %v277_v17  ;;  %v206_v5 = vld [vmem:[%s1069_s17 + $0x5c] sm:$0x1]  ;;  %v1130_v14 = vld [vmem:[%s1069_s17 + $0x54] sm:$0xff] }
  0x15   : > { %v312_v32 = vor.u32 %v311_v21, %v307_v16  ;;  %v321_v34 = vshll.u32 %v1090_v19, 16  ;;  %v442_v35 = vrot.slane %v285_v20, 1  ;;  %v1103_v37 = vpack.c.b16 %v278_v27, %v278_v27  ;;  %v1134_v17 = vld [vmem:[%s1069_s17 + $0x60] sm:$0xff] }
  0x16   : > { %v446_v28 = vsel %vm434_vm0, %v444_v11, %v445_v18  ;;  %v440_v29 = vsel %vm434_vm0, %v438_v15, %v439_v23  ;;  %v448_v30 = vrot.slane %v287_v25, 1  ;;  %v316_v33 = vrot.slane %v314_v24, 1 }
  0x17   : > { %471 = vrot.lane.b32.xlu0 %v446_v28, %s1031_s18  ;;  %467 = vrot.lane.b32.xlu1 %v440_v29, %s1031_s18  ;;  %v357_v38 = vshll.u32 %v1094_v26, 16  ;;  %v331_v40 = vshrl.u32 %v1072_v0, 16  ;;  %v333_v41 = vshll.u32 %v1072_v0, 16  ;;  %v355_v42 = vshrl.u32 %v1094_v26, 16 }
  0x18   : > { %v449_v36 = vsel %vm434_vm0, %v447_v22, %v448_v30  ;;  %v319_v43 = vshrl.u32 %v1090_v19, 16  ;;  %v326_v44 = vshll.u32 %v285_v20, 16  ;;  %v338_v45 = vshll.u32 %v286_v10, 16  ;;  %v212_v30 = vld [vmem:[%s1069_s17 + $0x74] sm:$0x1] }
  0x19   : > { %473 = vrot.lane.b32.xlu2 %v449_v36, %s1031_s18  ;;  %v317_v46 = vsel %vm293_vm1, %v312_v32, %v316_v33  ;;  %v323_v47 = vrot.slane %v321_v34, 1  ;;  %v335_v48 = vrot.slane %v333_v41, 1  ;;  %v279_v50 = vunpack.c.l.b16 %v203_v39  ;;  %v1151_v41 = vld [vmem:[%s1069_s17 + $0x6c] sm:$0xff] }
  0x1a   : > { %v443_v51 = vsel %vm434_vm0, %v441_v31, %v442_v35  ;;  %v359_v52 = vrot.slane %v357_v38, 1  ;;  %v362_v53 = vshll.u32 %v1103_v37, 16  ;;  %v340_v54 = vrot.slane %v338_v45, 1 }
  0x1b   : > { %v336_v55 = vor.u32 %v335_v48, %v331_v40  ;;  %v328_v56 = vrot.slane %v326_v44, 1  ;;  %v343_v57 = vshrl.u32 %v1081_v8, 16  ;;  %v345_v58 = vshll.u32 %v1081_v8, 16 }
  0x1c   : > { %v350_v59 = vshll.u32 %v287_v25, 16  ;;  %v324_v60 = vor.u32 %v323_v47, %v319_v43  ;;  %v289_v62 = vpack.c.b16 %v279_v50, %v279_v50  ;;  %v369_v63 = vshll.u32 %v1114_v49, 16 }
  0x1d   : > { %v341_v61 = vsel %vm293_vm1, %v336_v55, %v340_v54  ;;  %v360_v1 = vor.u32 %v359_v52, %v355_v42  ;;  %v364_v3 = vrot.slane %v362_v53, 1  ;;  %v347_v4 = vrot.slane %v345_v58, 1  ;;  %v1162_v55 = vld [vmem:[%s1069_s17] sm:$0xff] }
  0x1e   : > { %v367_v7 = vshrl.u32 %v1114_v49, 16  ;;  %v352_v10 = vrot.slane %v350_v59, 1  ;;  %v329_v11 = vsel %vm293_vm1, %v324_v60, %v328_v56  ;;  %v371_v12 = vrot.slane %v369_v63, 1 }
  0x1f   : > { %416 = vrot.lane.b32.xlu0 %v317_v46, %s1032_s19  ;;  %469 = vrot.lane.b32.xlu1 %v443_v51, %s1031_s18  ;;  %v348_v9 = vor.u32 %v347_v4, %v343_v57  ;;  %v374_v13 = vshll.u32 %v289_v62, 16  ;;  %v280_v15 = vunpack.c.l.b16 %v206_v5  ;;  %v365_v16 = vsel %vm293_vm1, %v360_v1, %v364_v3  ;;  %v185_v51 = vld [vmem:[%s1069_s17 + $0x8] sm:$0x1] }
  0x20   : > { %v281_v18 = vunpack.c.l.b16 %v209_v6  ;;  %v450_v20 = vrot.slane %v1094_v26, 1  ;;  %v451_v21 = vrot.slane %v1103_v37, 1  ;;  %v372_v23 = vor.u32 %v371_v12, %v367_v7 }
  0x21   : > { %420 = vrot.lane.b32.xlu2 %v341_v61, %s1032_s19  ;;  %v353_v22 = vsel %vm293_vm1, %v348_v9, %v352_v10  ;;  %v376_v24 = vrot.slane %v374_v13, 1  ;;  %v290_v25 = vpack.c.b16 %v280_v15, %v280_v15  ;;  %v381_v27 = vshll.u32 %v1130_v14, 16 }
  0x22   : > { %v291_v28 = vpack.c.b16 %v281_v18, %v281_v18  ;;  %v393_v29 = vshll.u32 %v1134_v17, 16  ;;  %v452_v31 = vsel %vm434_vm0, %v450_v20, %v451_v21  ;;  %v453_v32 = vrot.slane %v1114_v49, 1 }
  0x23   : > { %v454_v33 = vrot.slane %v289_v62, 1  ;;  %v377_v34 = vsel %vm293_vm1, %v372_v23, %v376_v24  ;;  %v379_v35 = vshrl.u32 %v1130_v14, 16  ;;  %v383_v36 = vrot.slane %v381_v27, 1 }
  0x24   : > { %v386_v37 = vshll.u32 %v290_v25, 16  ;;  %v391_v38 = vshrl.u32 %v1134_v17, 16  ;;  %v395_v39 = vrot.slane %v393_v29, 1  ;;  %v398_v40 = vshll.u32 %v291_v28, 16 }
  0x25   : > { %v282_v42 = vunpack.c.l.b16 %v212_v30  ;;  %v455_v43 = vsel %vm434_vm0, %v453_v32, %v454_v33  ;;  %v384_v44 = vor.u32 %v383_v36, %v379_v35  ;;  %v405_v50 = vshll.u32 %v1151_v41, 16 }
  0x26   : > { %v388_v45 = vrot.slane %v386_v37, 1  ;;  %v396_v46 = vor.u32 %v395_v39, %v391_v38  ;;  %v400_v47 = vrot.slane %v398_v40, 1  ;;  %v456_v52 = vrot.slane %v1130_v14, 1 }
  0x27   : > { %418 = vrot.lane.b32.xlu0 %v329_v11, %s1032_s19  ;;  %424 = vrot.lane.b32.xlu1 %v365_v16, %s1032_s19  ;;  %v292_v48 = vpack.c.b16 %v282_v42, %v282_v42  ;;  %v457_v53 = vrot.slane %v290_v25, 1  ;;  %v273_v56 = vunpack.c.l.b16 %v185_v51  ;;  %v403_v58 = vshrl.u32 %v1151_v41, 16 }
  0x28   : > { %v389_v54 = vsel %vm293_vm1, %v384_v44, %v388_v45  ;;  %v401_v57 = vsel %vm293_vm1, %v396_v46, %v400_v47  ;;  %v407_v59 = vrot.slane %v405_v50, 1  ;;  %v459_v62 = vrot.slane %v1134_v17, 1 }
  0x29   : > { %422 = vrot.lane.b32.xlu2 %v353_v22, %s1032_s19  ;;  %v410_v60 = vshll.u32 %v292_v48, 16  ;;  %v458_v61 = vsel %vm434_vm0, %v456_v52, %v457_v53  ;;  %v460_v63 = vrot.slane %v291_v28, 1  ;;  %v283_v1 = vpack.c.b16 %v273_v56, %v273_v56  ;;  %v606_v56 = vld [vmem:[%s1375_s1 + $0x10] sm:$0x3] }
  0x2a   : > { %v297_v3 = vshll.u32 %v1162_v55, 16  ;;  %v408_v4 = vor.u32 %v407_v59, %v403_v58  ;;  %v462_v6 = vrot.slane %v1151_v41, 1  ;;  %v463_v7 = vrot.slane %v292_v48, 1 }
  0x2b   : > { %v412_v5 = vrot.slane %v410_v60, 1  ;;  %v461_v9 = vsel %vm434_vm0, %v459_v62, %v460_v63  ;;  %v295_v10 = vshrl.u32 %v1162_v55, 16  ;;  %v302_v12 = vshll.u32 %v283_v1, 16  ;;  %v1000_v60 = vld [vmem:[%s1375_s1 + $0x8] sm:$0xff] }
  0x2c   : > { %v299_v11 = vrot.slane %v297_v3, 1  ;;  %v464_v15 = vsel %vm434_vm0, %v462_v6, %v463_v7  ;;  %v435_v20 = vrot.slane %v1162_v55, 1  ;;  %v436_v21 = vrot.slane %v283_v1, 1 }
  0x2d   : > { %v413_v13 = vsel %vm293_vm1, %v408_v4, %v412_v5  ;;  %v304_v18 = vrot.slane %v302_v12, 1 }
  0x2e   : > { %v300_v16 = vor.u32 %v299_v11, %v295_v10  ;;  %v437_v23 = vsel %vm434_vm0, %v435_v20, %v436_v21 }
  0x2f   : > { %426 = vrot.lane.b32.xlu0 %v377_v34, %s1032_s19  ;;  %475 = vrot.lane.b32.xlu1 %v452_v31, %s1031_s18 }
  0x30   : > { %v305_v22 = vsel %vm293_vm1, %v300_v16, %v304_v18 }
  0x31   : > { %477 = vrot.lane.b32.xlu2 %v455_v43, %s1031_s18 }
  0x37   : > { %428 = vrot.lane.b32.xlu0 %v389_v54, %s1032_s19  ;;  %430 = vrot.lane.b32.xlu1 %v401_v57, %s1032_s19  ;;  %v616_v57 = vunpack.c.l.b16 %v606_v56 }
  0x39   : > { %479 = vrot.lane.b32.xlu2 %v458_v61, %s1031_s18  ;;  %v619_v58 = vpack.c.b16 %v616_v57, %v616_v57 }
  0x3b   : > { %v641_v59 = vsel %vm639_vm4, %v619_v58, 0 }
  0x3c   : > { %1001 = vmatpush.bf16.msra.mxu1 %v641_v59  ;;  %648 = vmatpush.bf16.msra.mxu0 %v641_v59 }
  0x3d   : > { %1002 = vmatpush.bf16.msra.mxu2 %v641_v59  ;;  %1003 = vmatpush.bf16.msra.mxu3 %v641_v59 }
  0x3f   : > { %481 = vrot.lane.b32.xlu0 %v461_v9, %s1031_s18  ;;  %432 = vrot.lane.b32.xlu1 %v413_v13, %s1032_s19 }
  0x40   : > { %1004 = vmatpush.bf16.msra.mxu1 %v1000_v60  ;;  %649 = vmatpush.bf16.msra.mxu0 %v1000_v60 }
  0x41   : > { %483 = vrot.lane.b32.xlu2 %v464_v15, %s1031_s18  ;;  %1005 = vmatpush.bf16.msra.mxu2 %v1000_v60 }
  0x42   : > { %1006 = vmatpush.bf16.msra.mxu3 %v1000_v60 }
  0x47   : > { %414 = vrot.lane.b32.xlu0 %v305_v22, %s1032_s19  ;;  %465 = vrot.lane.b32.xlu1 %v437_v23, %s1031_s18 }
  0x73   : > { %v474_v24 = vpop.permute.xlu2 %473 }
  0x7b   : > { %v421_v25 = vpop.permute.xlu2 %420 }
  0x7c   : > { %v493_v27 = vsel %vm485_vm2, %v1072_v0, %v421_v25 }
  0x83   : > { %v423_v0 = vpop.permute.xlu2 %422 }
  0x84   : > { %v495_v35 = vsel %vm485_vm2, %v1081_v8, %v423_v0 }
  0x85   : > { %v1204_v39 = vsel %vm506_vm3, %v495_v35, %v474_v24 }
  0x89   : > { %v472_v28 = vpop.permute.xlu0 %471  ;;  %v468_v29 = vpop.permute.xlu1 %467 }
  0x8a   : > { %v1188_v30 = vsel %vm506_vm3, %v493_v27, %v472_v28 }
  0x8b   : > { %539 = vrot.lane.b32.xlu1 %v1188_v30, %s1033_s20  ;;  %v478_v40 = vpop.permute.xlu2 %477 }
  0x91   : > { %v417_v31 = vpop.permute.xlu0 %416  ;;  %v470_v32 = vpop.permute.xlu1 %469 }
  0x92   : > { %v489_v33 = vsel %vm485_vm2, %v1076_v2, %v417_v31 }
  0x93   : > { %v1195_v34 = vsel %vm506_vm3, %v489_v33, %v468_v29  ;;  %v480_v46 = vpop.permute.xlu2 %479 }
  0x94   : > { %535 = vrot.lane.b32.xlu2 %v1195_v34, %s1033_s20 }
  0x99   : > { %v419_v36 = vpop.permute.xlu0 %418  ;;  %v425_v37 = vpop.permute.xlu1 %424 }
  0x9a   : > { %v491_v38 = vsel %vm485_vm2, %v1090_v19, %v419_v36  ;;  %v497_v8 = vsel %vm485_vm2, %v1094_v26, %v425_v37 }
  0x9b   : > { %v512_v2 = vsel %vm506_vm3, %v491_v38, %v470_v32  ;;  %v484_v53 = vpop.permute.xlu2 %483 }
  0x9c   : > { %556 = vrot.lane.b32.xlu2 %v1204_v39, %s1034_s21  ;;  %552 = vrot.lane.b32.xlu0 %v512_v2, %s1034_s21 }
  0xa1   : > { %v427_v42 = vpop.permute.xlu0 %426  ;;  %v476_v43 = vpop.permute.xlu1 %475 }
  0xa2   : > { %v499_v19 = vsel %vm485_vm2, %v1114_v49, %v427_v42  ;;  %v1218_v45 = vsel %vm506_vm3, %v497_v8, %v476_v43 }
  0xa3   : > { %v1215_v44 = vsel %vm506_vm3, %v499_v19, %v478_v40 }
  0xa4   : > { %537 = vrot.lane.b32.xlu2 %v512_v2, %s1033_s20  ;;  %560 = vrot.lane.b32.xlu1 %v1215_v44, %s1034_s21 }
  0xa5   : > { %543 = vrot.lane.b32.xlu0 %v1218_v45, %s1033_s20 }
  0xa9   : > { %v429_v26 = vpop.permute.xlu0 %428  ;;  %v431_v48 = vpop.permute.xlu1 %430 }
  0xaa   : > { %v501_v47 = vsel %vm485_vm2, %v1130_v14, %v429_v26  ;;  %v503_v50 = vsel %vm485_vm2, %v1134_v17, %v431_v48 }
  0xab   : > { %v1228_v49 = vsel %vm506_vm3, %v501_v47, %v480_v46 }
  0xac   : > { %547 = vrot.lane.b32.xlu1 %v1228_v49, %s1033_s20 }
  0xad   : > { %554 = vrot.lane.b32.xlu0 %v1188_v30, %s1034_s21 }
  0xb1   : > { %v482_v51 = vpop.permute.xlu0 %481  ;;  %v433_v14 = vpop.permute.xlu1 %432 }
  0xb2   : > { %v524_v52 = vsel %vm506_vm3, %v503_v50, %v482_v51  ;;  %v505_v17 = vsel %vm485_vm2, %v1151_v41, %v433_v14  ;;  %v999_v41 = vld [vmem:[%s1375_s1] sm:$0xff] }
  0xb3   : > { %564 = vrot.lane.b32.xlu2 %v524_v52, %s1034_s21  ;;  %v526_v54 = vsel %vm506_vm3, %v505_v17, %v484_v53  ;;  %1007 = vmatpush.bf16.msra.mxu1 %v999_v41 }
  0xb4   : > { %558 = vrot.lane.b32.xlu1 %v1218_v45, %s1034_s21  ;;  %650 = vmatpush.bf16.msra.mxu0 %v999_v41 }
  0xb5   : > { %541 = vrot.lane.b32.xlu0 %v1204_v39, %s1033_s20  ;;  %1008 = vmatpush.bf16.msra.mxu2 %v999_v41 }
  0xb6   : > { %1009 = vmatpush.bf16.msra.mxu3 %v999_v41 }
  0xb9   : > { %v466_v62 = vpop.permute.xlu1 %465  ;;  %v415_v5 = vpop.permute.xlu0 %414 }
  0xba   : > { %v487_v6 = vsel %vm485_vm2, %v1162_v55, %v415_v5 }
  0xbb   : > { %545 = vrot.lane.b32.xlu2 %v1215_v44, %s1033_s20  ;;  %v508_v7 = vsel %vm506_vm3, %v487_v6, %v466_v62 }
  0xbc   : > { %549 = vrot.lane.b32.xlu1 %v524_v52, %s1033_s20 }
  0xbd   : > { %562 = vrot.lane.b32.xlu0 %v1228_v49, %s1034_s21 }
  0xc3   : > { %566 = vrot.lane.b32.xlu2 %v526_v54, %s1034_s21 }
  0xee   : > { %v536_v61 = vpop.permute.xlu2 %535 }
  0xef   : > { %v570_v9 = vsel %vm568_vm6, %v508_v7, %v536_v61 }
  0xf6   : > { %v557_v1 = vpop.permute.xlu2 %556 }
  0xfd   : > { %v540_v63 = vpop.permute.xlu1 %539 }
  0xfe   : > { %v574_v3 = vsel %vm568_vm6, %v512_v2, %v540_v63  ;;  %v538_v12 = vpop.permute.xlu2 %537 }
  0xff   : > { %v591_v4 = vsel %vm585_vm5, %v574_v3, %v557_v1  ;;  %v572_v21 = vsel %vm568_vm6, %v1195_v34, %v538_v12 }
 0x100   : > { %980 = vmatmul.msk.bf16.vlgmr.msra.gmra.mxu1 %vm622_vm7, %v591_v4 }
 0x10d   : > { %v565_v55 = vpop.permute.xlu2 %564 }
 0x10e   : > { %v553_v10 = vpop.permute.xlu0 %552 }
 0x10f   : > { %v587_v11 = vsel %vm585_vm5, %v570_v9, %v553_v10 }
 0x110   : > { %978 = vmatmul.msk.bf16.vlgmr.msra.gmra.mxu0 %vm622_vm7, %v587_v11 }
 0x115   : > { %v546_v27 = vpop.permute.xlu2 %545 }
 0x116   : > { %v561_v13 = vpop.permute.xlu1 %560  ;;  %v580_v0 = vsel %vm568_vm6, %v1218_v45, %v546_v27 }
 0x117   : > { %v544_v15 = vpop.permute.xlu0 %543 }
 0x118   : > { %v578_v16 = vsel %vm568_vm6, %v1204_v39, %v544_v15 }
 0x119   : > { %v595_v18 = vsel %vm585_vm5, %v578_v16, %v561_v13 }
 0x11a   : > { %982 = vmatmul.msk.bf16.vlgmr.msra.gmra.mxu2 %vm622_vm7, %v595_v18 }
 0x11d   : > { %v567_v33 = vpop.permute.xlu2 %566 }
 0x11e   : > { %v548_v20 = vpop.permute.xlu1 %547 }
 0x11f   : > { %v582_v22 = vsel %vm568_vm6, %v1215_v44, %v548_v20  ;;  %v555_v23 = vpop.permute.xlu0 %554 }
 0x120   : > { %v589_v24 = vsel %vm585_vm5, %v572_v21, %v555_v23  ;;  %v599_v25 = vsel %vm585_vm5, %v582_v22, %v565_v55 }
 0x121   : > { %979 = vmatmul.msk.bf16.gmra.mxu0 %vm622_vm7, %v589_v24  ;;  %984 = vmatmul.msk.bf16.vlgmr.msra.gmra.mxu3 %vm622_vm7, %v599_v25 }
 0x126   : > { %v559_v28 = vpop.permute.xlu1 %558 }
 0x127   : > { %v542_v29 = vpop.permute.xlu0 %541 }
 0x128   : > { %v576_v31 = vsel %vm568_vm6, %v1188_v30, %v542_v29 }
 0x129   : > { %v593_v32 = vsel %vm585_vm5, %v576_v31, %v559_v28 }
 0x12a   : > { %981 = vmatmul.msk.bf16.gmra.mxu1 %vm622_vm7, %v593_v32 }
 0x12e   : > { %v550_v34 = vpop.permute.xlu1 %549 }
 0x12f   : > { %v584_v35 = vsel %vm568_vm6, %v1228_v49, %v550_v34  ;;  %v563_v36 = vpop.permute.xlu0 %562 }
 0x130   : > { %v597_v37 = vsel %vm585_vm5, %v580_v0, %v563_v36  ;;  %v601_v38 = vsel %vm585_vm5, %v584_v35, %v567_v33 }
 0x131   : > { %983 = vmatmul.msk.bf16.gmra.mxu2 %vm622_vm7, %v597_v37  ;;  %985 = vmatmul.msk.bf16.gmra.mxu3 %vm622_vm7, %v601_v38 }
 0x17d   : > { %v662_v30 = vpop.f32.mrf.mxu1 }
 0x17e   : > { %v696_v39 = vpack.c.bf16 %v662_v30, %v662_v30 }
 0x180   : > { %713 = vst.msk [vmem:[%s1297_s4 + $0x10] sm:$0xf] %vm708_vm8, %v696_v39  ;;  %v729_v56 = vunpack.c.l.bf16 %v696_v39 }
 0x182   : > { %v782_v10 = vmul.f32 %v729_v56, %v729_v56  ;;  %v748_v55 = vsel %vm506_vm3, %v729_v56, 0.0 }
 0x184   : > { %v801_v25 = vsel %vm506_vm3, %v782_v10, 0.0 }
 0x185   : > { %v664_v2 = vpop.f32.mrf.mxu1 }
 0x186   : > { %v697_v40 = vpack.c.bf16 %v664_v2, %v664_v2 }
 0x188   : > { %714 = vst.msk [vmem:[%s1297_s4 + $0x14] sm:$0xf] %vm708_vm8, %v697_v40  ;;  %v730_v3 = vunpack.c.l.bf16 %v697_v40 }
 0x18a   : > { %v783_v20 = vmul.f32 %v730_v3, %v730_v3  ;;  %v750_v27 = vsel %vm506_vm3, %v730_v3, 0.0 }
 0x18c   : > { %v803_v0 = vsel %vm506_vm3, %v783_v20, 0.0 }
 0x18d   : > { %v652_v42 = vpop.f32.mrf.mxu0 }
 0x18e   : > { %v692_v8 = vpack.c.bf16 %v652_v42, %v652_v42 }
 0x190   : > { %709 = vst.msk [vmem:[%s1297_s4] sm:$0xf] %vm708_vm8, %v692_v8  ;;  %v725_v49 = vunpack.c.l.bf16 %v692_v8 }
 0x192   : > { %v778_v52 = vmul.f32 %v725_v49, %v725_v49  ;;  %v741_v59 = vsel %vm506_vm3, %v725_v49, 0.0 }
 0x194   : > { %v794_v4 = vsel %vm506_vm3, %v778_v52, 0.0 }
 0x195   : > { %v654_v43 = vpop.f32.mrf.mxu0 }
 0x196   : > { %v693_v19 = vpack.c.bf16 %v654_v43, %v654_v43 }
 0x198   : > { %710 = vst.msk [vmem:[%s1297_s4 + $0x4] sm:$0xf] %vm708_vm8, %v693_v19  ;;  %v726_v26 = vunpack.c.l.bf16 %v693_v19 }
 0x19a   : > { %v779_v50 = vmul.f32 %v726_v26, %v726_v26  ;;  %v742_v14 = vsel %vm506_vm3, %v726_v26, 0.0 }
 0x19b   : > { %v743_v63 = vadd.f32 %v742_v14, %v741_v59 }
 0x19c   : > { %v795_v60 = vsel %vm506_vm3, %v779_v50, 0.0 }
 0x19d   : > { %v672_v44 = vpop.f32.mrf.mxu2  ;;  %v796_v7 = vadd.f32 %v795_v60, %v794_v4 }
 0x19e   : > { %v700_v45 = vpack.c.bf16 %v672_v44, %v672_v44  ;;  %v657_v46 = vpop.f32.mrf.mxu0 }
 0x19f   : > { %v694_v47 = vpack.c.bf16 %v657_v46, %v657_v46 }
 0x1a0   : > { %717 = vst.msk [vmem:[%s1297_s4 + $0x20] sm:$0xf] %vm708_vm8, %v700_v45  ;;  %v733_v31 = vunpack.c.l.bf16 %v700_v45 }
 0x1a1   : > { %711 = vst.msk [vmem:[%s1297_s4 + $0x8] sm:$0xf] %vm708_vm8, %v694_v47  ;;  %v727_v48 = vunpack.c.l.bf16 %v694_v47 }
 0x1a2   : > { %v786_v39 = vmul.f32 %v733_v31, %v733_v31  ;;  %v756_v47 = vsel %vm506_vm3, %v733_v31, 0.0 }
 0x1a3   : > { %v780_v17 = vmul.f32 %v727_v48, %v727_v48  ;;  %v744_v41 = vsel %vm506_vm3, %v727_v48, 0.0 }
 0x1a4   : > { %v682_v51 = vpop.f32.mrf.mxu3  ;;  %v745_v9 = vadd.f32 %v744_v41, %v743_v63 }
 0x1a5   : > { %v674_v53 = vpop.f32.mrf.mxu2  ;;  %v1312_v54 = vpack.c.bf16 %v682_v51, %v682_v51  ;;  %v797_v5 = vsel %vm506_vm3, %v780_v17, 0.0  ;;  %v809_v51 = vsel %vm506_vm3, %v786_v39, 0.0 }
 0x1a6   : > { %v701_v57 = vpack.c.bf16 %v674_v53, %v674_v53  ;;  %v659_v58 = vpop.f32.mrf.mxu0  ;;  %v798_v15 = vadd.f32 %v797_v5, %v796_v7 }
 0x1a7   : > { %721 = vst.msk [vmem:[%s1297_s4 + $0x30] sm:$0xf] %vm708_vm8, %v1312_v54  ;;  %v695_v61 = vpack.c.bf16 %v659_v58, %v659_v58  ;;  %v667_v62 = vpop.f32.mrf.mxu1  ;;  %v737_v56 = vunpack.c.l.bf16 %v1312_v54 }
 0x1a8   : > { %718 = vst.msk [vmem:[%s1297_s4 + $0x24] sm:$0xf] %vm708_vm8, %v701_v57  ;;  %v698_v1 = vpack.c.bf16 %v667_v62, %v667_v62  ;;  %v734_v19 = vunpack.c.l.bf16 %v701_v57 }
 0x1a9   : > { %712 = vst.msk [vmem:[%s1297_s4 + $0xc] sm:$0xf] %vm708_vm8, %v695_v61  ;;  %v728_v6 = vunpack.c.l.bf16 %v695_v61  ;;  %v790_v54 = vmul.f32 %v737_v56, %v737_v56 }
 0x1aa   : > { %715 = vst.msk [vmem:[%s1297_s4 + $0x18] sm:$0xf] %vm708_vm8, %v698_v1  ;;  %v731_v13 = vunpack.c.l.bf16 %v698_v1  ;;  %v787_v52 = vmul.f32 %v734_v19, %v734_v19  ;;  %v758_v17 = vsel %vm506_vm3, %v734_v19, 0.0 }
 0x1ab   : > { %v746_v11 = vsel %vm506_vm3, %v728_v6, 0.0  ;;  %v781_v12 = vmul.f32 %v728_v6, %v728_v6  ;;  %v817_v20 = vsel %vm506_vm3, %v790_v54, 0.0 }
 0x1ac   : > { %v747_v16 = vadd.f32 %v746_v11, %v745_v9  ;;  %v684_v18 = vpop.f32.mrf.mxu3  ;;  %v784_v28 = vmul.f32 %v731_v13, %v731_v13  ;;  %v752_v35 = vsel %vm506_vm3, %v731_v13, 0.0  ;;  %v811_v60 = vsel %vm506_vm3, %v787_v52, 0.0 }
 0x1ad   : > { %v799_v21 = vsel %vm506_vm3, %v781_v12, 0.0  ;;  %v705_v22 = vpack.c.bf16 %v684_v18, %v684_v18  ;;  %v764_v12 = vsel %vm506_vm3, %v737_v56, 0.0 }
 0x1ae   : > { %v749_v23 = vadd.f32 %v748_v55, %v747_v16  ;;  %v800_v24 = vadd.f32 %v799_v21, %v798_v15  ;;  %v805_v30 = vsel %vm506_vm3, %v784_v28, 0.0 }
 0x1af   : > { %722 = vst.msk [vmem:[%s1297_s4 + $0x34] sm:$0xf] %vm708_vm8, %v705_v22  ;;  %v669_v29 = vpop.f32.mrf.mxu1  ;;  %v738_v1 = vunpack.c.l.bf16 %v705_v22 }
 0x1b0   : > { %v802_v32 = vadd.f32 %v801_v25, %v800_v24  ;;  %v751_v33 = vadd.f32 %v750_v27, %v749_v23  ;;  %v699_v34 = vpack.c.bf16 %v669_v29, %v669_v29 }
 0x1b1   : > { %v791_v13 = vmul.f32 %v738_v1, %v738_v1  ;;  %v766_v21 = vsel %vm506_vm3, %v738_v1, 0.0 }
 0x1b2   : > { %v753_v36 = vadd.f32 %v752_v35, %v751_v33  ;;  %v804_v37 = vadd.f32 %v803_v0, %v802_v32  ;;  %716 = vst.msk [vmem:[%s1297_s4 + $0x1c] sm:$0xf] %vm708_vm8, %v699_v34  ;;  %v732_v38 = vunpack.c.l.bf16 %v699_v34 }
 0x1b3   : > { %v819_v25 = vsel %vm506_vm3, %v791_v13, 0.0 }
 0x1b4   : > { %v806_v2 = vadd.f32 %v805_v30, %v804_v37  ;;  %v754_v40 = vsel %vm506_vm3, %v732_v38, 0.0  ;;  %v785_v42 = vmul.f32 %v732_v38, %v732_v38  ;;  %v677_v8 = vpop.f32.mrf.mxu2  ;;  %v687_v43 = vpop.f32.mrf.mxu3 }
 0x1b5   : > { %v755_v44 = vadd.f32 %v754_v40, %v753_v36  ;;  %v702_v45 = vpack.c.bf16 %v677_v8, %v677_v8  ;;  %v706_v46 = vpack.c.bf16 %v687_v43, %v687_v43 }
 0x1b6   : > { %v807_v26 = vsel %vm506_vm3, %v785_v42, 0.0 }
 0x1b7   : > { %v808_v49 = vadd.f32 %v807_v26, %v806_v2  ;;  %719 = vst.msk [vmem:[%s1297_s4 + $0x28] sm:$0xf] %vm708_vm8, %v702_v45  ;;  %v735_v48 = vunpack.c.l.bf16 %v702_v45  ;;  %v757_v50 = vadd.f32 %v756_v47, %v755_v44  ;;  %v739_v6 = vunpack.c.l.bf16 %v706_v46 }
 0x1b8   : > { %723 = vst.msk [vmem:[%s1297_s4 + $0x38] sm:$0xf] %vm708_vm8, %v706_v46 }
 0x1b9   : > { %v810_v14 = vadd.f32 %v809_v51, %v808_v49  ;;  %v788_v53 = vmul.f32 %v735_v48, %v735_v48  ;;  %v759_v57 = vadd.f32 %v758_v17, %v757_v50  ;;  %v760_v41 = vsel %vm506_vm3, %v735_v48, 0.0 }
 0x1ba   : > { %v792_v22 = vmul.f32 %v739_v6, %v739_v6  ;;  %v768_v27 = vsel %vm506_vm3, %v739_v6, 0.0 }
 0x1bb   : > { %v812_v63 = vadd.f32 %v811_v60, %v810_v14  ;;  %v813_v3 = vsel %vm506_vm3, %v788_v53, 0.0  ;;  %v761_v5 = vadd.f32 %v760_v41, %v759_v57 }
 0x1bc   : > { %v679_v58 = vpop.f32.mrf.mxu2  ;;  %v689_v59 = vpop.f32.mrf.mxu3  ;;  %v821_v32 = vsel %vm506_vm3, %v792_v22, 0.0 }
 0x1bd   : > { %v703_v61 = vpack.c.bf16 %v679_v58, %v679_v58  ;;  %v707_v62 = vpack.c.bf16 %v689_v59, %v689_v59  ;;  %v814_v10 = vadd.f32 %v813_v3, %v812_v63 }
 0x1bf   : > { %720 = vst.msk [vmem:[%s1297_s4 + $0x2c] sm:$0xf] %vm708_vm8, %v703_v61  ;;  %v736_v4 = vunpack.c.l.bf16 %v703_v61  ;;  %v740_v16 = vunpack.c.l.bf16 %v707_v62 }
 0x1c0   : > { %724 = vst.msk [vmem:[%s1297_s4 + $0x3c] sm:$0xf] %vm708_vm8, %v707_v62 }
 0x1c1   : > { %v762_v7 = vsel %vm506_vm3, %v736_v4, 0.0  ;;  %v789_v9 = vmul.f32 %v736_v4, %v736_v4  ;;  %v793_v28 = vmul.f32 %v740_v16, %v740_v16  ;;  %v770_v33 = vsel %vm506_vm3, %v740_v16, 0.0 }
 0x1c2   : > { %v763_v11 = vadd.f32 %v762_v7, %v761_v5 }
 0x1c3   : > { %v815_v15 = vsel %vm506_vm3, %v789_v9, 0.0  ;;  %v823_v35 = vsel %vm506_vm3, %v793_v28, 0.0 }
 0x1c4   : > { %v765_v18 = vadd.f32 %v764_v12, %v763_v11  ;;  %v816_v55 = vadd.f32 %v815_v15, %v814_v10 }
 0x1c6   : > { %v818_v23 = vadd.f32 %v817_v20, %v816_v55  ;;  %v767_v24 = vadd.f32 %v766_v21, %v765_v18 }
 0x1c8   : > { %v769_v29 = vadd.f32 %v768_v27, %v767_v24  ;;  %v820_v31 = vadd.f32 %v819_v25, %v818_v23 }
 0x1ca   : > { %v771_v34 = vadd.f32 %v770_v33, %v769_v29  ;;  %v822_v0 = vadd.f32 %v821_v32, %v820_v31 }
 0x1cc   : > { %v772_v36 = vrot.slane %v771_v34, 4  ;;  %v824_v37 = vadd.f32 %v823_v35, %v822_v0 }
 0x1ce   : > { %v773_v38 = vadd.f32 %v772_v36, %v771_v34  ;;  %v825_v30 = vrot.slane %v824_v37, 4 }
 0x1d0   : > { %v774_v39 = vrot.slane %v773_v38, 2  ;;  %v826_v2 = vadd.f32 %v825_v30, %v824_v37 }
 0x1d2   : > { %v775_v40 = vadd.f32 %v774_v39, %v773_v38  ;;  %v827_v42 = vrot.slane %v826_v2, 2 }
 0x1d4   : > { %v776_v8 = vrot.slane %v775_v40, 1  ;;  %v828_v43 = vadd.f32 %v827_v42, %v826_v2 }
 0x1d6   : > { %v829_v19 = vrot.slane %v828_v43, 1  ;;  %v777_v44 = vadd.f32 %v776_v8, %v775_v40 }
 0x1d8   : > { %v830_v45 = vadd.f32 %v829_v19, %v828_v43 }
 0x1da   : > { %v832_v46 = vsel %vm831_vm9, %v777_v44, %v830_v45 }
 0x1db   : > { %834 = vst.msk [vmem:[%s181_s8] sm:$0x3] %vm833_vm10, %v832_v46 }
 0x1dc PF: > { %s14_s12 = sadd.s32 1, %s1029_s12  }
 0x1dd   : > { %p11_p4 = scmp.ge.s32.totalorder %s14_s12, 6  }
 0x1df   :  { %13 = sbr.rel (!%p11_p4) target bundleno = 1 (0x1), region = 70 }

// kernel: double_conv.4
= control target key start
LH: loop header
LB: loop body
LE: loop exit
PB: predicated region body
PF: predicated region fallthrough
CT: control target
= control target key end

     0   :  { %s1381_s18 = smov 0   ;;  %s1858_s0 = inlined_call_operand.vmem [shape: bf16[4,10,18,8], index: 0, kind: input, shape index: {}]   ;;  %s1859_s1 = inlined_call_operand.vmem [shape: bf16[72,8], index: 1, kind: input, shape index: {}]   ;;  %s1860_s2 = inlined_call_operand.vmem [shape: f32[1,8], index: 2, kind: input, shape index: {}]   ;;  %s1861_s3 = inlined_call_operand.vmem [shape: f32[1,8], index: 3, kind: input, shape index: {}]   ;;  %s1862_s4 = inlined_call_operand.vmem [shape: bf16[4,128,8], index: 4, kind: output, shape index: {0}]   ;;  %s1863_s5 = inlined_call_operand.vmem [shape: f32[4,2,8], index: 5, kind: output, shape index: {1}]  }
   0x1 LB: > { %s1387_s19 = sadd.s32 4294967295, %s1345_s18   ;;  %p1246_p0 = scmp.ge.s32.totalorder %s1345_s18, 1  ;;  %s1345_s18 = sphi %s1381_s18, %s16_s18  }
   0x2   : > { %p190_p1 = scmp.lt.s32.totalorder %s1345_s18, 5 }
   0x4   : > { %p191_p2 = pnand %p1246_p0, %p190_p1 }
   0x5   : > { %p222_p3 = scmp.lt.s32.totalorder (!%p191_p2), %s1387_s19, 3  ;;  %s1347_s29 = smov (!%p191_p2), 16  }
   0x6   : > { %194 = sbr.rel (%p191_p2) target bundleno = 496 (0x1f0), region = 36  ;;  %s1348_s30 = smov (!%p191_p2), 8  }
   0x7   : > { %s400_s6 = ssub.s32 (!%p191_p2), 0, %s1387_s19  ;;  %p399_p4 = scmp.lt.s32.totalorder (!%p191_p2), %s1387_s19, 0 }
   0x8   : > { %s1516_s7 = smin.u32 (!%p191_p2), %s1387_s19, %s400_s6  ;;  %s1349_s13 = smov (!%p191_p2), 24  }
   0x9   : > { %s402_s8 = sand.u32 (!%p191_p2), 1, %s1516_s7   ;;  %s1350_s14 = smov (!%p191_p2), 48  }
   0xa   : > { %s403_s9 = ssub.s32 (!%p191_p2), 0, %s402_s8 }
   0xb   : > { %v395_v0 = vlaneseq  ;;  %s1393_s20 = scalar_select %p222_p3, %s1387_s19, 3  ;;  %v1409_v3 = vld [vmem:[%s1860_s2] ss:$0 sm:$0xff]  ;;  %vm739_vm2 = vcmask 1046528   ;;  %vm598_vm3 = vsmask.f32 7424 }
   0xc   : > { %v1414_v4 = vld [vmem:[%s1861_s3] ss:$0 sm:$0xff]  ;;  %s1865_s9 = smov (!%p399_p4, %s403_s9), %s402_s8  ;;  %vm790_vm10 = vcmask 64512   ;;  %vm811_vm11 = vcmask 130048   ;;  %vm960_vm12 = vcmask 1043456   ;;  %vm890_vm13 = vcmask 392192  }
   0xd   : > { %v1395_v1 = vshrl.u32 %v395_v0, 7  ;;  %s1324_s21 = smul.u32 120, %s1393_s20  ;;  %p1253_p5 = scmp.lt.s32.totalorder %s1865_s9, 0  ;;  %vm873_vm14 = vcmask 195584   ;;  %vm943_vm15 = vcmask 588800  }
   0xe   : > { %s409_s10 = sadd.s32 2, %s1865_s9  ;;  %s1280_s27 = sshll.u32 %s1393_s20, 6 }
   0xf   : > { %v1399_v2 = vadd.s32 16, %v1395_v1  ;;  %s1404_s24 = scalar_lea.vmem %s1858_s0, %s1324_s21  ;;  %vm411_vm0 = vcmp.ge.s32.totalorder %v1395_v1, 1  ;;  %s1867_s10 = smov (!%p1253_p5, %s409_s10), %s1865_s9 }
  0x10   : > { %v246_v5 = vld [vmem:[%s1404_s24 + $0x24] sm:$0xff]   ;;  %v248_v6 = vld [vmem:[%s1404_s24 + $0x2c] sm:$0x1]  ;;  %v242_v11 = vld [vmem:[%s1404_s24 + $0x14] sm:$0x1]  ;;  %p430_p6 = scmp.lt.s32.totalorder %s1867_s10, 1 }
  0x11   : > { %vm416_vm1 = vcmp.le.s32.totalorder %v1399_v2, 16  ;;  %v240_v7 = vld [vmem:[%s1404_s24 + $0xc] sm:$0xff]   ;;  %v276_v8 = vunpack.c.l.bf16 %v246_v5  ;;  %v277_v9 = vunpack.c.h.bf16 %v246_v5  ;;  %v278_v10 = vunpack.c.l.bf16 %v248_v6  ;;  %v1305_v13 = vld [vmem:[%s1404_s24 + $0x18] sm:$0xff]   ;;  %v245_v14 = vld [vmem:[%s1404_s24 + $0x20] sm:$0x1]  ;;  %p420_p7 = scmp.gt.s32.totalorder %s1867_s10, 0 }
  0x12   : > { %v270_v12 = vunpack.c.l.bf16 %v240_v7  ;;  %v271_v15 = vunpack.c.h.bf16 %v240_v7  ;;  %v272_v16 = vunpack.c.l.bf16 %v242_v11  ;;  %v1291_v17 = vunpack.c.l.bf16 %v1305_v13  ;;  %v1306_v55 = vld [vmem:[%s1404_s24 + $0x30] sm:$0xff]   ;;  %s431_s11 = scalar_select %p430_p6, 1, 0 }
  0x13   : > { %v1292_v18 = vunpack.c.h.bf16 %v1305_v13  ;;  %v310_v19 = vmul.f32 %v1409_v3, %v276_v8  ;;  %v311_v20 = vmul.f32 %v1409_v3, %v277_v9  ;;  %v312_v21 = vmul.f32 %v1409_v3, %v278_v10  ;;  %s1619_s12 = scalar_select %p420_p7, 1, 0 }
  0x14   : > { %v304_v22 = vmul.f32 %v1409_v3, %v270_v12  ;;  %v305_v23 = vmul.f32 %v1409_v3, %v271_v15  ;;  %v306_v24 = vmul.f32 %v1409_v3, %v272_v16  ;;  %v275_v25 = vunpack.c.l.bf16 %v245_v14  ;;  %v251_v16 = vld [vmem:[%s1404_s24 + $0x38] sm:$0x1]  ;;  %s1250_s6 = sshll.u32 %s1393_s20, 1 }
  0x15   : > { %v307_v26 = vmul.f32 %v1409_v3, %v1291_v17  ;;  %v344_v27 = vadd.f32 %v1414_v4, %v310_v19  ;;  %v345_v28 = vadd.f32 %v1414_v4, %v311_v20  ;;  %v346_v29 = vadd.f32 %v1414_v4, %v312_v21  ;;  %s235_s9 = scalar_lea.vmem %s1863_s5, %s1250_s6 }
  0x16   : > { %v338_v30 = vadd.f32 %v1414_v4, %v304_v22  ;;  %v339_v31 = vadd.f32 %v1414_v4, %v305_v23  ;;  %v340_v32 = vadd.f32 %v1414_v4, %v306_v24  ;;  %v308_v33 = vmul.f32 %v1409_v3, %v1292_v18 }
  0x17   : > { %v309_v34 = vmul.f32 %v1409_v3, %v275_v25  ;;  %v374_v35 = vmax.f32 %v344_v27, 0.0  ;;  %v375_v36 = vmax.f32 %v345_v28, 0.0  ;;  %v376_v37 = vmax.f32 %v346_v29, 0.0  ;;  %v252_v25 = vld [vmem:[%s1404_s24 + $0x3c] sm:$0xff]  }
  0x18   : > { %v368_v38 = vmax.f32 %v338_v30, 0.0  ;;  %v369_v39 = vmax.f32 %v339_v31, 0.0  ;;  %v370_v40 = vmax.f32 %v340_v32, 0.0  ;;  %v341_v41 = vadd.f32 %v1414_v4, %v307_v26 }
  0x19   : > { %v342_v42 = vadd.f32 %v1414_v4, %v308_v33  ;;  %v467_v43 = vsel %vm411_vm0, %v374_v35, 0.0  ;;  %v469_v44 = vsel %vm416_vm1, %v376_v37, 0.0  ;;  %v498_v45 = vpack.c.bf16 %v375_v36, %v375_v36 }
  0x1a   : > { %v461_v46 = vsel %vm411_vm0, %v368_v38, 0.0  ;;  %v497_v47 = vpack.c.bf16 %v467_v43, %v467_v43  ;;  %v499_v48 = vpack.c.bf16 %v469_v44, %v469_v44  ;;  %v463_v49 = vsel %vm416_vm1, %v370_v40, 0.0 }
  0x1b   : > { %v491_v50 = vpack.c.bf16 %v461_v46, %v461_v46  ;;  %v545_v51 = vunpack.c.l.b16 %v498_v45  ;;  %v492_v52 = vpack.c.bf16 %v369_v39, %v369_v39  ;;  %v493_v53 = vpack.c.bf16 %v463_v49, %v463_v49 }
  0x1c   : > { %v343_v54 = vadd.f32 %v1414_v4, %v309_v34  ;;  %v544_v56 = vunpack.c.l.b16 %v497_v47  ;;  %v581_v57 = vunpack.c.l.b16 %v499_v48  ;;  %v371_v59 = vmax.f32 %v341_v41, 0.0  ;;  %v254_v34 = vld [vmem:[%s1404_s24 + $0x44] sm:$0x1] }
  0x1d   : > { %v540_v58 = vunpack.c.l.b16 %v491_v50  ;;  %v541_v60 = vunpack.c.l.b16 %v492_v52  ;;  %v579_v61 = vunpack.c.l.b16 %v493_v53  ;;  %v372_v62 = vmax.f32 %v342_v42, 0.0 }
  0x1e   : > { %v373_v63 = vmax.f32 %v343_v54, 0.0  ;;  %v1451_v0 = vpack.c.b16 %v545_v51, %v544_v56  ;;  %v1453_v5 = vpack.c.b16 %v581_v57, %v581_v57  ;;  %v464_v6 = vsel %vm411_vm0, %v371_v59, 0.0 }
  0x1f   : > { %v1295_v7 = vunpack.c.l.bf16 %v1306_v55  ;;  %v1457_v8 = vpack.c.b16 %v541_v60, %v540_v58  ;;  %v589_v9 = vpack.c.b16 %v579_v61, %v579_v61  ;;  %v494_v11 = vpack.c.bf16 %v464_v6, %v464_v6 }
  0x20   : > { %v466_v10 = vsel %vm416_vm1, %v373_v63, 0.0  ;;  %v749_v12 = vrot.slane %v1451_v0, 1  ;;  %v750_v13 = vrot.slane %v1453_v5, 1  ;;  %v495_v14 = vpack.c.bf16 %v372_v62, %v372_v62 }
  0x21   : > { %v496_v15 = vpack.c.bf16 %v466_v10, %v466_v10  ;;  %v743_v17 = vrot.slane %v1457_v8, 1  ;;  %v744_v18 = vrot.slane %v589_v9, 1  ;;  %v542_v19 = vunpack.c.l.b16 %v494_v11 }
  0x22   : > { %v612_v20 = vshrl.u32 %v1457_v8, 16  ;;  %v751_v21 = vsel %vm739_vm2, %v749_v12, %v750_v13  ;;  %v543_v22 = vunpack.c.l.b16 %v495_v14  ;;  %v614_v24 = vshll.u32 %v1457_v8, 16 }
  0x23   : > { %v580_v23 = vunpack.c.l.b16 %v496_v15  ;;  %776 = vrot.lane.b32.xlu0 %v751_v21, %s1347_s29  ;;  %v745_v26 = vsel %vm739_vm2, %v743_v17, %v744_v18  ;;  %v619_v27 = vshll.u32 %v589_v9, 16  ;;  %v1296_v28 = vunpack.c.h.bf16 %v1306_v55 }
  0x24   : > { %v281_v29 = vunpack.c.l.bf16 %v251_v16  ;;  %772 = vrot.lane.b32.xlu1 %v745_v26, %s1347_s29  ;;  %v1472_v30 = vpack.c.b16 %v543_v22, %v542_v19  ;;  %v616_v32 = vrot.slane %v614_v24, 1  ;;  %v313_v33 = vmul.f32 %v1409_v3, %v1295_v7  ;;  %v1307_v26 = vld [vmem:[%s1404_s24 + $0x48] sm:$0xff]  }
  0x25   : > { %v590_v31 = vpack.c.b16 %v580_v23, %v580_v23  ;;  %v621_v35 = vrot.slane %v619_v27, 1  ;;  %v314_v36 = vmul.f32 %v1409_v3, %v1296_v28  ;;  %v282_v38 = vunpack.c.l.bf16 %v252_v25 }
  0x26   : > { %v315_v37 = vmul.f32 %v1409_v3, %v281_v29  ;;  %v746_v39 = vrot.slane %v1472_v30, 1  ;;  %v617_v41 = vor.u32 %v616_v32, %v612_v20  ;;  %v347_v42 = vadd.f32 %v1414_v4, %v313_v33  ;;  %v257_v32 = vld [vmem:[%s1404_s24 + $0x50] sm:$0x1] }
  0x27   : > { %v747_v40 = vrot.slane %v590_v31, 1  ;;  %v348_v43 = vadd.f32 %v1414_v4, %v314_v36  ;;  %v283_v45 = vunpack.c.h.bf16 %v252_v25  ;;  %v284_v46 = vunpack.c.l.bf16 %v254_v34 }
  0x28   : > { %v349_v44 = vadd.f32 %v1414_v4, %v315_v37  ;;  %v622_v48 = vsel %vm598_vm3, %v617_v41, %v621_v35  ;;  %v377_v49 = vmax.f32 %v347_v42, 0.0  ;;  %v316_v50 = vmul.f32 %v1409_v3, %v282_v38 }
  0x29   : > { %v748_v47 = vsel %vm739_vm2, %v746_v39, %v747_v40  ;;  %v378_v51 = vmax.f32 %v348_v43, 0.0  ;;  %v317_v53 = vmul.f32 %v1409_v3, %v283_v45  ;;  %v318_v54 = vmul.f32 %v1409_v3, %v284_v46 }
  0x2a   : > { %v379_v52 = vmax.f32 %v349_v44, 0.0  ;;  %v470_v55 = vsel %vm411_vm0, %v377_v49, 0.0  ;;  %v350_v56 = vadd.f32 %v1414_v4, %v316_v50  ;;  %v624_v57 = vshrl.u32 %v1472_v30, 16 }
  0x2b   : > { %v626_v58 = vshll.u32 %v1472_v30, 16  ;;  %721 = vrot.lane.b32.xlu0 %v622_v48, %s1348_s30  ;;  %v500_v60 = vpack.c.bf16 %v470_v55, %v470_v55  ;;  %v501_v61 = vpack.c.bf16 %v378_v51, %v378_v51  ;;  %v351_v62 = vadd.f32 %v1414_v4, %v317_v53 }
  0x2c   : > { %v472_v59 = vsel %vm416_vm1, %v379_v52, 0.0  ;;  %774 = vrot.lane.b32.xlu1 %v748_v47, %s1347_s29  ;;  %v352_v6 = vadd.f32 %v1414_v4, %v318_v54  ;;  %v380_v7 = vmax.f32 %v350_v56, 0.0  ;;  %v631_v13 = vshll.u32 %v590_v31, 16 }
  0x2d   : > { %v502_v63 = vpack.c.bf16 %v472_v59, %v472_v59  ;;  %v628_v9 = vrot.slane %v626_v58, 1  ;;  %v546_v10 = vunpack.c.l.b16 %v500_v60  ;;  %v547_v11 = vunpack.c.l.b16 %v501_v61  ;;  %v258_v60 = vld [vmem:[%s1404_s24 + $0x54] sm:$0xff]  }
  0x2e   : > { %v381_v12 = vmax.f32 %v351_v62, 0.0  ;;  %v382_v15 = vmax.f32 %v352_v6, 0.0  ;;  %v473_v16 = vsel %vm411_vm0, %v380_v7, 0.0  ;;  %v633_v21 = vrot.slane %v631_v13, 1 }
  0x2f   : > { %v582_v14 = vunpack.c.l.b16 %v502_v63  ;;  %v629_v17 = vor.u32 %v628_v9, %v624_v57  ;;  %v1500_v18 = vpack.c.b16 %v547_v11, %v546_v10  ;;  %v503_v19 = vpack.c.bf16 %v473_v16, %v473_v16 }
  0x30   : > { %v504_v20 = vpack.c.bf16 %v381_v12, %v381_v12  ;;  %v475_v23 = vsel %vm416_vm1, %v382_v15, 0.0  ;;  %v636_v24 = vshrl.u32 %v1451_v0, 16  ;;  %v638_v25 = vshll.u32 %v1451_v0, 16  ;;  %v260_v12 = vld [vmem:[%s1404_s24 + $0x5c] sm:$0x1] }
  0x31   : > { %v592_v22 = vpack.c.b16 %v582_v14, %v582_v14  ;;  %v752_v27 = vrot.slane %v1500_v18, 1  ;;  %v505_v28 = vpack.c.bf16 %v475_v23, %v475_v23  ;;  %v548_v29 = vunpack.c.l.b16 %v503_v19 }
  0x32   : > { %v549_v31 = vunpack.c.l.b16 %v504_v20  ;;  %v634_v34 = vsel %vm598_vm3, %v629_v17, %v633_v21  ;;  %v640_v35 = vrot.slane %v638_v25, 1  ;;  %v643_v36 = vshll.u32 %v1453_v5, 16  ;;  %v1308_v17 = vld [vmem:[%s1404_s24 + $0x60] sm:$0xff]  }
  0x33   : > { %v753_v33 = vrot.slane %v592_v22, 1  ;;  %v583_v38 = vunpack.c.l.b16 %v505_v28  ;;  %723 = vrot.lane.b32.xlu0 %v634_v34, %s1348_s30  ;;  %v1299_v39 = vunpack.c.l.bf16 %v1307_v26  ;;  %v1300_v40 = vunpack.c.h.bf16 %v1307_v26 }
  0x34   : > { %v1512_v37 = vpack.c.b16 %v549_v31, %v548_v29  ;;  %v641_v42 = vor.u32 %v640_v35, %v636_v24  ;;  %v645_v43 = vrot.slane %v643_v36, 1  ;;  %v287_v44 = vunpack.c.l.bf16 %v257_v32 }
  0x35   : > { %v754_v41 = vsel %vm739_vm2, %v752_v27, %v753_v33  ;;  %v593_v45 = vpack.c.b16 %v583_v38, %v583_v38  ;;  %v319_v49 = vmul.f32 %v1409_v3, %v1299_v39  ;;  %v320_v50 = vmul.f32 %v1409_v3, %v1300_v40  ;;  %v263_v27 = vld [vmem:[%s1404_s24 + $0x68] sm:$0x1] }
  0x36   : > { %778 = vrot.lane.b32.xlu2 %v754_v41, %s1347_s29  ;;  %v755_v5 = vrot.slane %v1512_v37, 1  ;;  %v660_v46 = vshrl.u32 %v1512_v37, 16  ;;  %v662_v47 = vshll.u32 %v1512_v37, 16  ;;  %v646_v48 = vsel %vm598_vm3, %v641_v42, %v645_v43 }
  0x37   : > { %v321_v51 = vmul.f32 %v1409_v3, %v287_v44  ;;  %v756_v52 = vrot.slane %v593_v45, 1  ;;  %v667_v54 = vshll.u32 %v593_v45, 16  ;;  %v648_v55 = vshrl.u32 %v1500_v18, 16 }
  0x38   : > { %v664_v53 = vrot.slane %v662_v47, 1  ;;  %v353_v56 = vadd.f32 %v1414_v4, %v319_v49  ;;  %v354_v57 = vadd.f32 %v1414_v4, %v320_v50  ;;  %v650_v59 = vshll.u32 %v1500_v18, 16 }
  0x39   : > { %v355_v58 = vadd.f32 %v1414_v4, %v321_v51  ;;  %v757_v61 = vsel %vm739_vm2, %v755_v5, %v756_v52  ;;  %v669_v63 = vrot.slane %v667_v54, 1  ;;  %v655_v6 = vshll.u32 %v592_v22, 16 }
  0x3a   : > { %v665_v62 = vor.u32 %v664_v53, %v660_v46  ;;  %780 = vrot.lane.b32.xlu1 %v757_v61, %s1347_s29  ;;  %v383_v7 = vmax.f32 %v353_v56, 0.0  ;;  %v384_v9 = vmax.f32 %v354_v57, 0.0  ;;  %v652_v11 = vrot.slane %v650_v59, 1 }
  0x3b   : > { %v385_v10 = vmax.f32 %v355_v58, 0.0  ;;  %v657_v14 = vrot.slane %v655_v6, 1  ;;  %v288_v15 = vunpack.c.l.bf16 %v258_v60  ;;  %v289_v16 = vunpack.c.h.bf16 %v258_v60 }
  0x3c   : > { %v670_v13 = vsel %vm598_vm3, %v665_v62, %v669_v63  ;;  %v476_v19 = vsel %vm411_vm0, %v383_v7, 0.0  ;;  %v507_v21 = vpack.c.bf16 %v384_v9, %v384_v9  ;;  %v653_v22 = vor.u32 %v652_v11, %v648_v55 }
  0x3d   : > { %v478_v20 = vsel %vm416_vm1, %v385_v10, 0.0  ;;  %v506_v23 = vpack.c.bf16 %v476_v19, %v476_v19  ;;  %v290_v25 = vunpack.c.l.bf16 %v260_v12  ;;  %v322_v26 = vmul.f32 %v1409_v3, %v288_v15 }
  0x3e   : > { %725 = vrot.lane.b32.xlu2 %v646_v48, %s1348_s30  ;;  %v508_v24 = vpack.c.bf16 %v478_v20, %v478_v20  ;;  %v551_v28 = vunpack.c.l.b16 %v507_v21  ;;  %v658_v29 = vsel %vm598_vm3, %v653_v22, %v657_v14  ;;  %v323_v31 = vmul.f32 %v1409_v3, %v289_v16  ;;  %v264_v21 = vld [vmem:[%s1404_s24 + $0x6c] sm:$0xff]  }
  0x3f   : > { %v1303_v32 = vunpack.c.l.bf16 %v1308_v17  ;;  %v550_v33 = vunpack.c.l.b16 %v506_v23  ;;  %v324_v35 = vmul.f32 %v1409_v3, %v290_v25  ;;  %v356_v36 = vadd.f32 %v1414_v4, %v322_v26  ;;  %v266_v26 = vld [vmem:[%s1404_s24 + $0x74] sm:$0x1] }
  0x40   : > { %v584_v34 = vunpack.c.l.b16 %v508_v24  ;;  %v357_v38 = vadd.f32 %v1414_v4, %v323_v31  ;;  %v1304_v39 = vunpack.c.h.bf16 %v1308_v17  ;;  %v293_v40 = vunpack.c.l.bf16 %v263_v27 }
  0x41   : > { %v325_v41 = vmul.f32 %v1409_v3, %v1303_v32  ;;  %v1561_v42 = vpack.c.b16 %v551_v28, %v550_v33  ;;  %v358_v44 = vadd.f32 %v1414_v4, %v324_v35  ;;  %v386_v45 = vmax.f32 %v356_v36, 0.0 }
  0x42   : > { %v594_v43 = vpack.c.b16 %v584_v34, %v584_v34  ;;  %729 = vrot.lane.b32.xlu1 %v670_v13, %s1348_s30  ;;  %v387_v5 = vmax.f32 %v357_v38, 0.0  ;;  %v326_v46 = vmul.f32 %v1409_v3, %v1304_v39  ;;  %v327_v47 = vmul.f32 %v1409_v3, %v293_v40 }
  0x43   : > { %v359_v48 = vadd.f32 %v1414_v4, %v325_v41  ;;  %v672_v49 = vshrl.u32 %v1561_v42, 16  ;;  %v674_v50 = vshll.u32 %v1561_v42, 16  ;;  %v388_v52 = vmax.f32 %v358_v44, 0.0 }
  0x44   : > { %v679_v51 = vshll.u32 %v594_v43, 16  ;;  %v479_v53 = vsel %vm411_vm0, %v386_v45, 0.0  ;;  %v510_v54 = vpack.c.bf16 %v387_v5, %v387_v5  ;;  %v360_v55 = vadd.f32 %v1414_v4, %v326_v46 }
  0x45   : > { %v361_v56 = vadd.f32 %v1414_v4, %v327_v47  ;;  %v676_v57 = vrot.slane %v674_v50, 1  ;;  %v481_v59 = vsel %vm416_vm1, %v388_v52, 0.0  ;;  %v509_v60 = vpack.c.bf16 %v479_v53, %v479_v53  ;;  %v1286_v53 = vld [vmem:[%s1404_s24] sm:$0xff]  }
  0x46   : > { %v681_v58 = vrot.slane %v679_v51, 1  ;;  %727 = vrot.lane.b32.xlu2 %v658_v29, %s1348_s30  ;;  %v511_v61 = vpack.c.bf16 %v481_v59, %v481_v59  ;;  %v553_v62 = vunpack.c.l.b16 %v510_v54  ;;  %v389_v63 = vmax.f32 %v359_v48, 0.0 }
  0x47   : > { %v390_v6 = vmax.f32 %v360_v55, 0.0  ;;  %v677_v7 = vor.u32 %v676_v57, %v672_v49  ;;  %v552_v9 = vunpack.c.l.b16 %v509_v60  ;;  %v391_v10 = vmax.f32 %v361_v56, 0.0 }
  0x48   : > { %v758_v11 = vrot.slane %v1561_v42, 1  ;;  %v585_v12 = vunpack.c.l.b16 %v511_v61  ;;  %v482_v13 = vsel %vm411_vm0, %v389_v63, 0.0  ;;  %v759_v15 = vrot.slane %v594_v43, 1 }
  0x49   : > { %v513_v14 = vpack.c.bf16 %v390_v6, %v390_v6  ;;  %v682_v16 = vsel %vm598_vm3, %v677_v7, %v681_v58  ;;  %v1588_v17 = vpack.c.b16 %v553_v62, %v552_v9  ;;  %v484_v19 = vsel %vm416_vm1, %v391_v10, 0.0  ;;  %v239_v58 = vld [vmem:[%s1404_s24 + $0x8] sm:$0x1] }
  0x4a   : > { %v512_v20 = vpack.c.bf16 %v482_v13, %v482_v13  ;;  %731 = vrot.lane.b32.xlu0 %v682_v16, %s1348_s30  ;;  %v595_v22 = vpack.c.b16 %v585_v12, %v585_v12  ;;  %v514_v23 = vpack.c.bf16 %v484_v19, %v484_v19  ;;  %v760_v25 = vsel %vm739_vm2, %v758_v11, %v759_v15 }
  0x4b   : > { %v555_v24 = vunpack.c.l.b16 %v513_v14  ;;  %v684_v27 = vshrl.u32 %v1588_v17, 16  ;;  %v686_v28 = vshll.u32 %v1588_v17, 16  ;;  %v761_v31 = vrot.slane %v1588_v17, 1 }
  0x4c   : > { %v554_v29 = vunpack.c.l.b16 %v512_v20  ;;  %v691_v32 = vshll.u32 %v595_v22, 16  ;;  %v586_v33 = vunpack.c.l.b16 %v514_v23  ;;  %v762_v34 = vrot.slane %v595_v22, 1 }
  0x4d   : > { %v294_v35 = vunpack.c.l.bf16 %v264_v21  ;;  %v688_v36 = vrot.slane %v686_v28, 1  ;;  %v295_v39 = vunpack.c.h.bf16 %v264_v21  ;;  %v296_v40 = vunpack.c.l.bf16 %v266_v26 }
  0x4e   : > { %v1601_v38 = vpack.c.b16 %v555_v24, %v554_v29  ;;  %782 = vrot.lane.b32.xlu2 %v760_v25, %s1347_s29  ;;  %v693_v41 = vrot.slane %v691_v32, 1  ;;  %v596_v43 = vpack.c.b16 %v586_v33, %v586_v33  ;;  %v763_v44 = vsel %vm739_vm2, %v761_v31, %v762_v34 }
  0x4f   : > { %v328_v45 = vmul.f32 %v1409_v3, %v294_v35  ;;  %v689_v5 = vor.u32 %v688_v36, %v684_v27  ;;  %v329_v51 = vmul.f32 %v1409_v3, %v295_v39  ;;  %v330_v52 = vmul.f32 %v1409_v3, %v296_v40 }
  0x50   : > { %v696_v46 = vshrl.u32 %v1601_v38, 16  ;;  %v698_v47 = vshll.u32 %v1601_v38, 16  ;;  %v764_v48 = vrot.slane %v1601_v38, 1  ;;  %v703_v49 = vshll.u32 %v596_v43, 16 }
  0x51   : > { %v765_v50 = vrot.slane %v596_v43, 1  ;;  %v694_v54 = vsel %vm598_vm3, %v689_v5, %v693_v41  ;;  %v362_v56 = vadd.f32 %v1414_v4, %v328_v45  ;;  %v432_v57 = vstv %s431_s11 }
  0x52   : > { %v700_v55 = vrot.slane %v698_v47, 1  ;;  %733 = vrot.lane.b32.xlu0 %v694_v54, %s1348_s30  ;;  %v705_v59 = vrot.slane %v703_v49, 1  ;;  %v363_v61 = vadd.f32 %v1414_v4, %v329_v51  ;;  %v364_v62 = vadd.f32 %v1414_v4, %v330_v52 }
  0x53   : > { %v766_v60 = vsel %vm739_vm2, %v764_v48, %v765_v50  ;;  %v392_v6 = vmax.f32 %v362_v56, 0.0  ;;  %vm433_vm4 = vcmp.eq.s32.totalorder %v432_v57, 1  ;;  %v1287_v7 = vunpack.c.l.bf16 %v1286_v53 }
  0x54   : > { %v701_v63 = vor.u32 %v700_v55, %v696_v46  ;;  %v393_v9 = vmax.f32 %v363_v61, 0.0  ;;  %v394_v10 = vmax.f32 %v364_v62, 0.0  ;;  %vm437_vm5 = vmand %vm411_vm0, %vm433_vm4  ;;  %v1288_v11 = vunpack.c.h.bf16 %v1286_v53 }
  0x55   : > { %v269_v12 = vunpack.c.l.bf16 %v239_v58  ;;  %vm439_vm6 = vmand %vm416_vm1, %vm433_vm4  ;;  %v485_v14 = vsel %vm437_vm5, %v392_v6, 0.0  ;;  %v301_v15 = vmul.f32 %v1409_v3, %v1287_v7  ;;  %v422_v16 = vstv %s1619_s12 }
  0x56   : > { %v706_v13 = vsel %vm598_vm3, %v701_v63, %v705_v59  ;;  %784 = vrot.lane.b32.xlu2 %v763_v44, %s1347_s29  ;;  %v486_v19 = vsel %vm433_vm4, %v393_v9, 0.0  ;;  %v487_v20 = vsel %vm439_vm6, %v394_v10, 0.0  ;;  %v515_v21 = vpack.c.bf16 %v485_v14, %v485_v14 }
  0x57   : > { %735 = vrot.lane.b32.xlu1 %v706_v13, %s1348_s30  ;;  %v302_v22 = vmul.f32 %v1409_v3, %v1288_v11  ;;  %v516_v23 = vpack.c.bf16 %v486_v19, %v486_v19  ;;  %v517_v24 = vpack.c.bf16 %v487_v20, %v487_v20  ;;  %v303_v25 = vmul.f32 %v1409_v3, %v269_v12 }
  0x58   : > { %v335_v26 = vadd.f32 %v1414_v4, %v301_v15  ;;  %v556_v27 = vunpack.c.l.b16 %v515_v21  ;;  %vm423_vm7 = vcmp.eq.s32.totalorder %v422_v16, 1 }
  0x59   : > { %v336_v28 = vadd.f32 %v1414_v4, %v302_v22  ;;  %v557_v29 = vunpack.c.l.b16 %v516_v23  ;;  %v587_v31 = vunpack.c.l.b16 %v517_v24  ;;  %v337_v32 = vadd.f32 %v1414_v4, %v303_v25  ;;  %vm424_vm8 = vmand %vm411_vm0, %vm423_vm7 }
  0x5a   : > { %v365_v33 = vmax.f32 %v335_v26, 0.0  ;;  %786 = vrot.lane.b32.xlu0 %v766_v60, %s1347_s29  ;;  %vm426_vm9 = vmand %vm416_vm1, %vm423_vm7  ;;  %vm1029_vm0 = vcmask 60416   ;;  %vm1152_vm1 = vcmask 1040384  }
  0x5b   : > { %v366_v34 = vmax.f32 %v336_v28, 0.0  ;;  %v1642_v35 = vpack.c.b16 %v557_v29, %v556_v27  ;;  %v597_v3 = vpack.c.b16 %v587_v31, %v587_v31  ;;  %v367_v36 = vmax.f32 %v337_v32, 0.0 }
  0x5c   : > { %v458_v39 = vsel %vm424_vm8, %v365_v33, 0.0  ;;  %v915_v33 = vld [vmem:[%s1859_s1 + $0x20] sm:$0xf] }
  0x5d   : > { %v459_v40 = vsel %vm423_vm7, %v366_v34, 0.0  ;;  %v488_v41 = vpack.c.bf16 %v458_v39, %v458_v39  ;;  %v708_v43 = vshrl.u32 %v1642_v35, 16  ;;  %v710_v4 = vshll.u32 %v1642_v35, 16 }
  0x5e   : > { %v715_v44 = vshll.u32 %v597_v3, 16  ;;  %v767_v1 = vrot.slane %v1642_v35, 1  ;;  %v768_v45 = vrot.slane %v597_v3, 1  ;;  %v460_v5 = vsel %vm426_vm9, %v367_v36, 0.0 }
  0x5f   : > { %v489_v46 = vpack.c.bf16 %v459_v40, %v459_v40  ;;  %v538_v47 = vunpack.c.l.b16 %v488_v41  ;;  %v712_v48 = vrot.slane %v710_v4, 1  ;;  %v490_v50 = vpack.c.bf16 %v460_v5, %v460_v5  ;;  %v1284_v5 = vld [vmem:[%s1859_s1 + $0x18] sm:$0xff] }
  0x60   : > { %v717_v49 = vrot.slane %v715_v44, 1  ;;  %v769_v2 = vsel %vm739_vm2, %v767_v1, %v768_v45 }
  0x61   : > { %v539_v51 = vunpack.c.l.b16 %v489_v46  ;;  %v713_v52 = vor.u32 %v712_v48, %v708_v43  ;;  %788 = vrot.lane.b32.xlu2 %v769_v2, %s1347_s29  ;;  %v578_v53 = vunpack.c.l.b16 %v490_v50  ;;  %v1283_v46 = vld [vmem:[%s1859_s1 + $0x10] sm:$0xff] }
  0x63   : > { %v1651_v54 = vpack.c.b16 %v539_v51, %v538_v47  ;;  %v718_v55 = vsel %vm598_vm3, %v713_v52, %v717_v49  ;;  %v588_v56 = vpack.c.b16 %v578_v53, %v578_v53  ;;  %v1281_v47 = vld [vmem:[%s1859_s1] sm:$0xff] }
  0x64   : > { %737 = vrot.lane.b32.xlu1 %v718_v55, %s1348_s30 }
  0x65   : > { %v600_v57 = vshrl.u32 %v1651_v54, 16  ;;  %v602_v58 = vshll.u32 %v1651_v54, 16  ;;  %v607_v59 = vshll.u32 %v588_v56, 16  ;;  %v740_v60 = vrot.slane %v1651_v54, 1 }
  0x66   : > { %v741_v61 = vrot.slane %v588_v56, 1 }
  0x67   : > { %v604_v62 = vrot.slane %v602_v58, 1  ;;  %v609_v63 = vrot.slane %v607_v59, 1 }
  0x68   : > { %v742_v7 = vsel %vm739_vm2, %v740_v60, %v741_v61  ;;  %vm1154_vm2 = vcmask 58368  }
  0x69   : > { %v605_v6 = vor.u32 %v604_v62, %v600_v57 }
  0x6b   : > { %v610_v9 = vsel %vm598_vm3, %v605_v6, %v609_v63 }
  0x6c   : > { %719 = vrot.lane.b32.xlu0 %v610_v9, %s1348_s30  ;;  %770 = vrot.lane.b32.xlu1 %v742_v7, %s1347_s29  ;;  %s1785_s30 = scalar_lea.vmem %s1862_s4, %s1280_s27 }
  0x90   : > { %v779_v10 = vpop.permute.xlu2 %778 }
  0x95   : > { %v777_v11 = vpop.permute.xlu0 %776 }
  0x96   : > { %v773_v14 = vpop.permute.xlu1 %772 }
  0x98   : > { %v726_v12 = vpop.permute.xlu2 %725 }
  0x99   : > { %v798_v13 = vsel %vm790_vm10, %v1451_v0, %v726_v12 }
  0x9a   : > { %v1665_v15 = vsel %vm811_vm11, %v798_v13, %v777_v11 }
  0x9b   : > { %844 = vrot.lane.b32.xlu1 %v1665_v15, %s1349_s13 }
  0x9d   : > { %v722_v16 = vpop.permute.xlu0 %721 }
  0x9e   : > { %v794_v19 = vsel %vm790_vm10, %v1457_v8, %v722_v16  ;;  %v775_v0 = vpop.permute.xlu1 %774 }
  0x9f   : > { %v1672_v20 = vsel %vm811_vm11, %v794_v19, %v773_v14 }
  0xa0   : > { %840 = vrot.lane.b32.xlu2 %v1672_v20, %s1349_s13  ;;  %v728_v21 = vpop.permute.xlu2 %727 }
  0xa1   : > { %v800_v22 = vsel %vm790_vm10, %v1500_v18, %v728_v21 }
  0xa2   : > { %v1681_v25 = vsel %vm811_vm11, %v800_v22, %v779_v10 }
  0xa5   : > { %v724_v23 = vpop.permute.xlu0 %723 }
  0xa6   : > { %v796_v24 = vsel %vm790_vm10, %v1472_v30, %v724_v23 }
  0xa7   : > { %v1684_v8 = vsel %vm811_vm11, %v796_v24, %v775_v0 }
  0xa8   : > { %861 = vrot.lane.b32.xlu2 %v1681_v25, %s1350_s14  ;;  %857 = vrot.lane.b32.xlu0 %v1684_v8, %s1350_s14  ;;  %v783_v28 = vpop.permute.xlu2 %782 }
  0xac   : > { %v781_v26 = vpop.permute.xlu1 %780 }
  0xb0   : > { %842 = vrot.lane.b32.xlu2 %v1684_v8, %s1349_s13  ;;  %v785_v3 = vpop.permute.xlu2 %784 }
  0xb4   : > { %v730_v18 = vpop.permute.xlu1 %729 }
  0xb5   : > { %v802_v30 = vsel %vm790_vm10, %v1512_v37, %v730_v18  ;;  %v933_v37 = vunpack.c.l.b16 %v915_v33 }
  0xb6   : > { %v1695_v27 = vsel %vm811_vm11, %v802_v30, %v781_v26 }
  0xb7   : > { %848 = vrot.lane.b32.xlu0 %v1695_v27, %s1349_s13  ;;  %v938_v34 = vpack.c.b16 %v933_v37, %v933_v37 }
  0xb9   : > { %v962_v36 = vsel %vm960_vm12, %v938_v34, 0 }
  0xba   : > { %1309 = vmatpush.bf16.msra.mxu1 %v962_v36  ;;  %967 = vmatpush.bf16.msra.mxu0 %v962_v36 }
  0xbb   : > { %1310 = vmatpush.bf16.msra.mxu2 %v962_v36  ;;  %1311 = vmatpush.bf16.msra.mxu3 %v962_v36  ;;  %v789_v1 = vpop.permute.xlu2 %788 }
  0xbc   : > { %v732_v29 = vpop.permute.xlu0 %731 }
  0xbd   : > { %v804_v31 = vsel %vm790_vm10, %v1561_v42, %v732_v29 }
  0xbe   : > { %v1702_v32 = vsel %vm811_vm11, %v804_v31, %v783_v28  ;;  %1312 = vmatpush.bf16.msra.mxu1 %v1284_v5  ;;  %968 = vmatpush.bf16.msra.mxu0 %v1284_v5 }
  0xbf   : > { %865 = vrot.lane.b32.xlu1 %v1702_v32, %s1350_s14  ;;  %859 = vrot.lane.b32.xlu0 %v1665_v15, %s1350_s14 }
  0xc0   : > { %1313 = vmatpush.bf16.msra.mxu2 %v1284_v5  ;;  %1314 = vmatpush.bf16.msra.mxu3 %v1284_v5 }
  0xc2   : > { %1315 = vmatpush.bf16.msra.mxu1 %v1283_v46  ;;  %969 = vmatpush.bf16.msra.mxu0 %v1283_v46 }
  0xc4   : > { %v734_v39 = vpop.permute.xlu0 %733  ;;  %1316 = vmatpush.bf16.msra.mxu2 %v1283_v46  ;;  %1317 = vmatpush.bf16.msra.mxu3 %v1283_v46 }
  0xc5   : > { %v806_v42 = vsel %vm790_vm10, %v1588_v17, %v734_v39 }
  0xc6   : > { %v1714_v40 = vsel %vm811_vm11, %v806_v42, %v785_v3 }
  0xc7   : > { %852 = vrot.lane.b32.xlu1 %v1714_v40, %s1349_s13  ;;  %846 = vrot.lane.b32.xlu0 %v1681_v25, %s1349_s13 }
  0xc9   : > { %v736_v41 = vpop.permute.xlu1 %735 }
  0xca   : > { %v808_v43 = vsel %vm790_vm10, %v1601_v38, %v736_v41 }
  0xcc   : > { %v787_v4 = vpop.permute.xlu0 %786 }
  0xcd   : > { %v829_v44 = vsel %vm811_vm11, %v808_v43, %v787_v4 }
  0xce   : > { %869 = vrot.lane.b32.xlu2 %v829_v44, %s1350_s14 }
  0xcf   : > { %863 = vrot.lane.b32.xlu1 %v1695_v27, %s1350_s14  ;;  %867 = vrot.lane.b32.xlu0 %v1714_v40, %s1350_s14 }
  0xd6   : > { %850 = vrot.lane.b32.xlu2 %v1702_v32, %s1349_s13  ;;  %v738_v17 = vpop.permute.xlu1 %737 }
  0xd7   : > { %854 = vrot.lane.b32.xlu1 %v829_v44, %s1349_s13  ;;  %v810_v38 = vsel %vm790_vm10, %v1642_v35, %v738_v17  ;;  %v1282_v35 = vld [vmem:[%s1859_s1 + $0x8] sm:$0xff] }
  0xd8   : > { %v831_v45 = vsel %vm811_vm11, %v810_v38, %v789_v1  ;;  %1318 = vmatpush.bf16.msra.mxu1 %v1282_v35  ;;  %970 = vmatpush.bf16.msra.mxu0 %v1282_v35 }
  0xd9   : > { %1319 = vmatpush.bf16.msra.mxu2 %v1282_v35  ;;  %1320 = vmatpush.bf16.msra.mxu3 %v1282_v35 }
  0xdc   : > { %1321 = vmatpush.bf16.msra.mxu1 %v1281_v47  ;;  %971 = vmatpush.bf16.msra.mxu0 %v1281_v47 }
  0xdd   : > { %1322 = vmatpush.bf16.msra.mxu2 %v1281_v47  ;;  %1323 = vmatpush.bf16.msra.mxu3 %v1281_v47 }
  0xde   : > { %871 = vrot.lane.b32.xlu2 %v831_v45, %s1350_s14  ;;  %v771_v49 = vpop.permute.xlu1 %770  ;;  %v720_v53 = vpop.permute.xlu0 %719 }
  0xdf   : > { %v792_v55 = vsel %vm790_vm10, %v1651_v54, %v720_v53 }
  0xe0   : > { %v813_v56 = vsel %vm811_vm11, %v792_v55, %v771_v49 }
  0xfa   : > { %v841_v48 = vpop.permute.xlu2 %840 }
  0xfb   : > { %v875_v57 = vsel %vm873_vm14, %v813_v56, %v841_v48 }
 0x102   : > { %v862_v2 = vpop.permute.xlu2 %861 }
 0x10a   : > { %v843_v61 = vpop.permute.xlu2 %842 }
 0x10b   : > { %v877_v63 = vsel %vm873_vm14, %v1672_v20, %v843_v61 }
 0x10d   : > { %v845_v50 = vpop.permute.xlu1 %844 }
 0x10e   : > { %v879_v51 = vsel %vm873_vm14, %v1684_v8, %v845_v50 }
 0x10f   : > { %v896_v52 = vsel %vm890_vm13, %v879_v51, %v862_v2 }
 0x110   : > { %1272 = vmatmul.msk.bf16.vlgmr.msra.gmra.mxu1 %vm943_vm15, %v896_v52 }
 0x11a   : > { %v858_v58 = vpop.permute.xlu0 %857 }
 0x11b   : > { %v892_v59 = vsel %vm890_vm13, %v875_v57, %v858_v58 }
 0x11c   : > { %1270 = vmatmul.msk.bf16.vlgmr.msra.gmra.mxu0 %vm943_vm15, %v892_v59 }
 0x128   : > { %v870_v10 = vpop.permute.xlu2 %869 }
 0x129   : > { %v849_v60 = vpop.permute.xlu0 %848 }
 0x12a   : > { %v883_v62 = vsel %vm873_vm14, %v1681_v25, %v849_v60 }
 0x130   : > { %v851_v16 = vpop.permute.xlu2 %850 }
 0x131   : > { %v866_v6 = vpop.permute.xlu1 %865  ;;  %v860_v7 = vpop.permute.xlu0 %859  ;;  %v885_v20 = vsel %vm873_vm14, %v1695_v27, %v851_v16 }
 0x132   : > { %v900_v54 = vsel %vm890_vm13, %v883_v62, %v866_v6  ;;  %v894_v9 = vsel %vm890_vm13, %v877_v63, %v860_v7 }
 0x133   : > { %1274 = vmatmul.msk.bf16.vlgmr.msra.gmra.mxu2 %vm943_vm15, %v900_v54  ;;  %1271 = vmatmul.msk.bf16.gmra.mxu0 %vm943_vm15, %v894_v9 }
 0x138   : > { %v872_v24 = vpop.permute.xlu2 %871 }
 0x139   : > { %v853_v11 = vpop.permute.xlu1 %852  ;;  %v847_v12 = vpop.permute.xlu0 %846 }
 0x13a   : > { %v887_v13 = vsel %vm873_vm14, %v1702_v32, %v853_v11  ;;  %v881_v19 = vsel %vm873_vm14, %v1665_v15, %v847_v12 }
 0x13b   : > { %v904_v14 = vsel %vm890_vm13, %v887_v13, %v870_v10 }
 0x13c   : > { %1276 = vmatmul.msk.bf16.vlgmr.msra.gmra.mxu3 %vm943_vm15, %v904_v14 }
 0x141   : > { %v864_v21 = vpop.permute.xlu1 %863  ;;  %v868_v0 = vpop.permute.xlu0 %867 }
 0x142   : > { %v898_v22 = vsel %vm890_vm13, %v881_v19, %v864_v21  ;;  %v902_v23 = vsel %vm890_vm13, %v885_v20, %v868_v0 }
 0x143   : > { %1273 = vmatmul.msk.bf16.gmra.mxu1 %vm943_vm15, %v898_v22  ;;  %1275 = vmatmul.msk.bf16.gmra.mxu2 %vm943_vm15, %v902_v23 }
 0x149   : > { %v855_v25 = vpop.permute.xlu1 %854 }
 0x14a   : > { %v889_v8 = vsel %vm873_vm14, %v1714_v40, %v855_v25 }
 0x14b   : > { %v906_v15 = vsel %vm890_vm13, %v889_v8, %v872_v24 }
 0x14c   : > { %1277 = vmatmul.msk.bf16.gmra.mxu3 %vm943_vm15, %v906_v15 }
 0x18d   : > { %v983_v26 = vpop.f32.mrf.mxu1 }
 0x18e   : > { %v1017_v18 = vpack.c.bf16 %v983_v26, %v983_v26 }
 0x190   : > { %1034 = vst.msk [vmem:[%s1785_s30 + $0x10] sm:$0xf] %vm1029_vm0, %v1017_v18  ;;  %v1050_v46 = vunpack.c.l.bf16 %v1017_v18 }
 0x192   : > { %v1103_v56 = vmul.f32 %v1050_v46, %v1050_v46  ;;  %v1069_v6 = vsel %vm790_vm10, %v1050_v46, 0.0 }
 0x194   : > { %v1122_v9 = vsel %vm790_vm10, %v1103_v56, 0.0 }
 0x195   : > { %v985_v30 = vpop.f32.mrf.mxu1 }
 0x196   : > { %v1018_v27 = vpack.c.bf16 %v985_v30, %v985_v30 }
 0x198   : > { %1035 = vst.msk [vmem:[%s1785_s30 + $0x14] sm:$0xf] %vm1029_vm0, %v1018_v27  ;;  %v1051_v57 = vunpack.c.l.bf16 %v1018_v27 }
 0x199   : > { %v973_v28 = vpop.f32.mrf.mxu0 }
 0x19a   : > { %v1013_v29 = vpack.c.bf16 %v973_v28, %v973_v28  ;;  %v1104_v10 = vmul.f32 %v1051_v57, %v1051_v57  ;;  %v1071_v13 = vsel %vm790_vm10, %v1051_v57, 0.0 }
 0x19c   : > { %1030 = vst.msk [vmem:[%s1785_s30] sm:$0xf] %vm1029_vm0, %v1013_v29  ;;  %v1046_v3 = vunpack.c.l.bf16 %v1013_v29  ;;  %v1124_v19 = vsel %vm790_vm10, %v1104_v10, 0.0 }
 0x19e   : > { %v1099_v40 = vmul.f32 %v1046_v3, %v1046_v3  ;;  %v1062_v17 = vsel %vm790_vm10, %v1046_v3, 0.0 }
 0x1a0   : > { %v1115_v35 = vsel %vm790_vm10, %v1099_v40, 0.0 }
 0x1a1   : > { %v975_v31 = vpop.f32.mrf.mxu0 }
 0x1a2   : > { %v1014_v32 = vpack.c.bf16 %v975_v31, %v975_v31 }
 0x1a4   : > { %1031 = vst.msk [vmem:[%s1785_s30 + $0x4] sm:$0xf] %vm1029_vm0, %v1014_v32  ;;  %v1047_v37 = vunpack.c.l.bf16 %v1014_v32 }
 0x1a6   : > { %v1100_v39 = vmul.f32 %v1047_v37, %v1047_v37  ;;  %v1063_v41 = vsel %vm790_vm10, %v1047_v37, 0.0 }
 0x1a7   : > { %v1064_v5 = vadd.f32 %v1063_v41, %v1062_v17 }
 0x1a8   : > { %v1116_v38 = vsel %vm790_vm10, %v1100_v39, 0.0 }
 0x1a9   : > { %v1117_v49 = vadd.f32 %v1116_v38, %v1115_v35 }
 0x1b0   : > { %v978_v33 = vpop.f32.mrf.mxu0 }
 0x1b1   : > { %v1015_v34 = vpack.c.bf16 %v978_v33, %v978_v33 }
 0x1b3   : > { %1032 = vst.msk [vmem:[%s1785_s30 + $0x8] sm:$0xf] %vm1029_vm0, %v1015_v34  ;;  %v1048_v36 = vunpack.c.l.bf16 %v1015_v34 }
 0x1b5   : > { %v1101_v4 = vmul.f32 %v1048_v36, %v1048_v36  ;;  %v1065_v1 = vsel %vm790_vm10, %v1048_v36, 0.0 }
 0x1b6   : > { %v993_v42 = vpop.f32.mrf.mxu2  ;;  %v1066_v50 = vadd.f32 %v1065_v1, %v1064_v5 }
 0x1b7   : > { %v1021_v43 = vpack.c.bf16 %v993_v42, %v993_v42  ;;  %v1118_v47 = vsel %vm790_vm10, %v1101_v4, 0.0 }
 0x1b8   : > { %v980_v44 = vpop.f32.mrf.mxu0  ;;  %v1119_v52 = vadd.f32 %v1118_v47, %v1117_v49 }
 0x1b9   : > { %1038 = vst.msk [vmem:[%s1785_s30 + $0x20] sm:$0xf] %vm1029_vm0, %v1021_v43  ;;  %v1016_v45 = vpack.c.bf16 %v980_v44, %v980_v44  ;;  %v1054_v22 = vunpack.c.l.bf16 %v1021_v43 }
 0x1bb   : > { %1033 = vst.msk [vmem:[%s1785_s30 + $0xc] sm:$0xf] %vm1029_vm0, %v1016_v45  ;;  %v1049_v48 = vunpack.c.l.bf16 %v1016_v45  ;;  %v1107_v29 = vmul.f32 %v1054_v22, %v1054_v22  ;;  %v1077_v36 = vsel %vm790_vm10, %v1054_v22, 0.0 }
 0x1bd   : > { %v1067_v2 = vsel %vm790_vm10, %v1049_v48, 0.0  ;;  %v1102_v51 = vmul.f32 %v1049_v48, %v1049_v48  ;;  %v1130_v43 = vsel %vm790_vm10, %v1107_v29, 0.0 }
 0x1be   : > { %v995_v53 = vpop.f32.mrf.mxu2  ;;  %v1068_v55 = vadd.f32 %v1067_v2, %v1066_v50 }
 0x1bf   : > { %v1022_v58 = vpack.c.bf16 %v995_v53, %v995_v53  ;;  %v1003_v59 = vpop.f32.mrf.mxu3  ;;  %v1120_v60 = vsel %vm790_vm10, %v1102_v51, 0.0 }
 0x1c0   : > { %v1025_v61 = vpack.c.bf16 %v1003_v59, %v1003_v59  ;;  %v1121_v62 = vadd.f32 %v1120_v60, %v1119_v52  ;;  %v988_v63 = vpop.f32.mrf.mxu1  ;;  %v1070_v54 = vadd.f32 %v1069_v6, %v1068_v55 }
 0x1c1   : > { %1039 = vst.msk [vmem:[%s1785_s30 + $0x24] sm:$0xf] %vm1029_vm0, %v1022_v58  ;;  %v1019_v7 = vpack.c.bf16 %v988_v63, %v988_v63  ;;  %v1055_v26 = vunpack.c.l.bf16 %v1022_v58 }
 0x1c2   : > { %1042 = vst.msk [vmem:[%s1785_s30 + $0x30] sm:$0xf] %vm1029_vm0, %v1025_v61  ;;  %v1123_v12 = vadd.f32 %v1122_v9, %v1121_v62  ;;  %v1072_v14 = vadd.f32 %v1071_v13, %v1070_v54  ;;  %v1058_v1 = vunpack.c.l.bf16 %v1025_v61 }
 0x1c3   : > { %1036 = vst.msk [vmem:[%s1785_s30 + $0x18] sm:$0xf] %vm1029_vm0, %v1019_v7  ;;  %v1052_v11 = vunpack.c.l.bf16 %v1019_v7  ;;  %v1108_v37 = vmul.f32 %v1055_v26, %v1055_v26  ;;  %v1079_v38 = vsel %vm790_vm10, %v1055_v26, 0.0 }
 0x1c4   : > { %v1125_v23 = vadd.f32 %v1124_v19, %v1123_v12  ;;  %v1111_v53 = vmul.f32 %v1058_v1, %v1058_v1  ;;  %v1085_v59 = vsel %vm790_vm10, %v1058_v1, 0.0 }
 0x1c5   : > { %v1105_v20 = vmul.f32 %v1052_v11, %v1052_v11  ;;  %v1073_v8 = vsel %vm790_vm10, %v1052_v11, 0.0  ;;  %v1132_v46 = vsel %vm790_vm10, %v1108_v37, 0.0 }
 0x1c6   : > { %v998_v16 = vpop.f32.mrf.mxu2  ;;  %v1074_v18 = vadd.f32 %v1073_v8, %v1072_v14  ;;  %v1138_v7 = vsel %vm790_vm10, %v1111_v53, 0.0 }
 0x1c7   : > { %v1005_v21 = vpop.f32.mrf.mxu3  ;;  %v1023_v0 = vpack.c.bf16 %v998_v16, %v998_v16  ;;  %v1126_v30 = vsel %vm790_vm10, %v1105_v20, 0.0 }
 0x1c8   : > { %v1026_v24 = vpack.c.bf16 %v1005_v21, %v1005_v21  ;;  %v990_v25 = vpop.f32.mrf.mxu1  ;;  %v1127_v31 = vadd.f32 %v1126_v30, %v1125_v23 }
 0x1c9   : > { %v1020_v15 = vpack.c.bf16 %v990_v25, %v990_v25  ;;  %1040 = vst.msk [vmem:[%s1785_s30 + $0x28] sm:$0xf] %vm1029_vm0, %v1023_v0  ;;  %v1056_v28 = vunpack.c.l.bf16 %v1023_v0 }
 0x1ca   : > { %1043 = vst.msk [vmem:[%s1785_s30 + $0x34] sm:$0xf] %vm1029_vm0, %v1026_v24  ;;  %v1059_v48 = vunpack.c.l.bf16 %v1026_v24 }
 0x1cb   : > { %1037 = vst.msk [vmem:[%s1785_s30 + $0x1c] sm:$0xf] %vm1029_vm0, %v1020_v15  ;;  %v1053_v27 = vunpack.c.l.bf16 %v1020_v15  ;;  %v1109_v42 = vmul.f32 %v1056_v28, %v1056_v28  ;;  %v1081_v45 = vsel %vm790_vm10, %v1056_v28, 0.0 }
 0x1cc   : > { %v1112_v60 = vmul.f32 %v1059_v48, %v1059_v48  ;;  %v1087_v54 = vsel %vm790_vm10, %v1059_v48, 0.0 }
 0x1cd   : > { %v1075_v32 = vsel %vm790_vm10, %v1053_v27, 0.0  ;;  %v1106_v33 = vmul.f32 %v1053_v27, %v1053_v27  ;;  %v1134_v49 = vsel %vm790_vm10, %v1109_v42, 0.0 }
 0x1ce   : > { %v1076_v34 = vadd.f32 %v1075_v32, %v1074_v18  ;;  %v1000_v3 = vpop.f32.mrf.mxu2  ;;  %v1140_v13 = vsel %vm790_vm10, %v1112_v60, 0.0 }
 0x1cf   : > { %v1128_v39 = vsel %vm790_vm10, %v1106_v33, 0.0  ;;  %v1008_v40 = vpop.f32.mrf.mxu3  ;;  %v1024_v41 = vpack.c.bf16 %v1000_v3, %v1000_v3 }
 0x1d0   : > { %v1078_v4 = vadd.f32 %v1077_v36, %v1076_v34  ;;  %v1129_v44 = vadd.f32 %v1128_v39, %v1127_v31  ;;  %v1027_v17 = vpack.c.bf16 %v1008_v40, %v1008_v40 }
 0x1d1   : > { %1041 = vst.msk [vmem:[%s1785_s30 + $0x2c] sm:$0xf] %vm1029_vm0, %v1024_v41  ;;  %v1057_v5 = vunpack.c.l.bf16 %v1024_v41 }
 0x1d2   : > { %v1131_v35 = vadd.f32 %v1130_v43, %v1129_v44  ;;  %v1080_v47 = vadd.f32 %v1079_v38, %v1078_v4  ;;  %1044 = vst.msk [vmem:[%s1785_s30 + $0x38] sm:$0xf] %vm1029_vm0, %v1027_v17  ;;  %v1060_v55 = vunpack.c.l.bf16 %v1027_v17 }
 0x1d3   : > { %v1083_v50 = vsel %vm790_vm10, %v1057_v5, 0.0  ;;  %v1110_v2 = vmul.f32 %v1057_v5, %v1057_v5 }
 0x1d4   : > { %v1082_v51 = vadd.f32 %v1081_v45, %v1080_v47  ;;  %v1133_v52 = vadd.f32 %v1132_v46, %v1131_v35  ;;  %v1113_v9 = vmul.f32 %v1060_v55, %v1060_v55  ;;  %v1089_v14 = vsel %vm790_vm10, %v1060_v55, 0.0 }
 0x1d5   : > { %v1136_v56 = vsel %vm790_vm10, %v1110_v2, 0.0 }
 0x1d6   : > { %v1135_v57 = vadd.f32 %v1134_v49, %v1133_v52  ;;  %v1084_v58 = vadd.f32 %v1083_v50, %v1082_v51  ;;  %v1142_v21 = vsel %vm790_vm10, %v1113_v9, 0.0 }
 0x1d7   : > { %v1010_v61 = vpop.f32.mrf.mxu3 }
 0x1d8   : > { %v1086_v62 = vadd.f32 %v1085_v59, %v1084_v58  ;;  %v1137_v63 = vadd.f32 %v1136_v56, %v1135_v57  ;;  %v1028_v6 = vpack.c.bf16 %v1010_v61, %v1010_v61 }
 0x1da   : > { %v1139_v10 = vadd.f32 %v1138_v7, %v1137_v63  ;;  %1045 = vst.msk [vmem:[%s1785_s30 + $0x3c] sm:$0xf] %vm1029_vm0, %v1028_v6  ;;  %v1061_v11 = vunpack.c.l.bf16 %v1028_v6  ;;  %v1088_v12 = vadd.f32 %v1087_v54, %v1086_v62 }
 0x1dc   : > { %v1090_v16 = vadd.f32 %v1089_v14, %v1088_v12  ;;  %v1114_v19 = vmul.f32 %v1061_v11, %v1061_v11  ;;  %v1141_v20 = vadd.f32 %v1140_v13, %v1139_v10  ;;  %v1091_v0 = vsel %vm790_vm10, %v1061_v11, 0.0 }
 0x1de   : > { %v1092_v22 = vadd.f32 %v1091_v0, %v1090_v16  ;;  %v1143_v23 = vadd.f32 %v1142_v21, %v1141_v20  ;;  %v1144_v24 = vsel %vm790_vm10, %v1114_v19, 0.0 }
 0x1e0   : > { %v1093_v25 = vrot.slane %v1092_v22, 4  ;;  %v1145_v8 = vadd.f32 %v1144_v24, %v1143_v23 }
 0x1e2   : > { %v1094_v15 = vadd.f32 %v1093_v25, %v1092_v22  ;;  %v1146_v26 = vrot.slane %v1145_v8, 4 }
 0x1e4   : > { %v1095_v18 = vrot.slane %v1094_v15, 2  ;;  %v1147_v30 = vadd.f32 %v1146_v26, %v1145_v8 }
 0x1e6   : > { %v1096_v27 = vadd.f32 %v1095_v18, %v1094_v15  ;;  %v1148_v28 = vrot.slane %v1147_v30, 2 }
 0x1e8   : > { %v1097_v29 = vrot.slane %v1096_v27, 1  ;;  %v1149_v31 = vadd.f32 %v1148_v28, %v1147_v30 }
 0x1ea   : > { %v1150_v32 = vrot.slane %v1149_v31, 1  ;;  %v1098_v33 = vadd.f32 %v1097_v29, %v1096_v27 }
 0x1ec   : > { %v1151_v37 = vadd.f32 %v1150_v32, %v1149_v31 }
 0x1ee   : > { %v1153_v34 = vsel %vm1152_vm1, %v1098_v33, %v1151_v37 }
 0x1ef   : > { %1155 = vst.msk [vmem:[%s235_s9] sm:$0x3] %vm1154_vm2, %v1153_v34 }
 0x1f0 PF: > { %s16_s18 = sadd.s32 1, %s1345_s18  }
 0x1f1   : > { %p13_p8 = scmp.ge.s32.totalorder %s16_s18, 6  }
 0x1f3   :  { %15 = sbr.rel (!%p13_p8) target bundleno = 1 (0x1), region = 78 }

</bundles_post_ra>
